<compile_context>
chip_gen: v7x
topology: tpu7x:2x2x1
jax: 0.10.0
libtpu: 0.0.40
codegen_flags: <defaults>
</compile_context>

<pallas_src>
import functools

import jax
import jax.numpy as jnp
from jax import lax
from jax.experimental import pallas as pl
from jax.experimental.pallas import tpu as pltpu


def _frru_kernel(B, H, W, s, Cp, Cz, Co,
                 y_ref, z_ref,
                 w1_ref, s1_ref, b1_ref,
                 w2_ref, s2_ref, b2_ref,
                 wr_ref, br_ref,
                 yout_ref, zout_ref):
    """B batch elements per grid step.  All compute (maxpool over phases,
    3x3 convs as 3 banded bf16 matmuls each, folded BN+ReLU, block-diagonal
    1x1 conv, nearest upsample + residual add) happens here."""
    M = B * H                        # matmul rows: one per (batch, image-row)

    # ---- MaxPool2d(scale) of z: max over the s*s phases (lane-dense) -------
    zp = z_ref[:, 0]                                     # (B, H, W*Cz)
    for p in range(1, s * s):
        zp = jnp.maximum(zp, z_ref[:, p])

    # ---- x = concat([y, pool(z)]) along lanes -> (B*H, W*Cp + W*Cz) --------
    # (free reshapes: only leading dims are merged, lane layout untouched)
    x = jnp.concatenate([y_ref[...].reshape(M, W * Cp),
                         zp.reshape(M, W * Cz)], axis=1)

    # image-row index of every matmul row (for the h-edge zero-padding masks)
    hh = lax.broadcasted_iota(jnp.int32, (M, 1), 0) % H

    def conv3x3_bn_relu(inp, w_ref, scale_ref, bias_ref, lanes_out):
        # 3x3 conv (stride 1, padding 1).  dx and the channel contraction are
        # folded into banded (W*Cin, W*Co) weights, so only 3 matmuls (one
        # per dy) are needed.  dy shifts are sublane rolls + h-boundary
        # masks; everything stays lane-dense.
        acc = jnp.zeros((M, lanes_out), jnp.float32)
        for ky in range(3):
            dy = ky - 1
            tap = inp if dy == 0 else pltpu.roll(inp, (-dy) % M, axis=0)
            if dy != 0:
                valid = (hh + dy >= 0) & (hh + dy < H)
                tap = jnp.where(valid, tap, 0.0)
            acc += jnp.dot(tap.astype(jnp.bfloat16), w_ref[ky],
                           preferred_element_type=jnp.float32)
        # folded conv-bias + (inference-mode) BN + ReLU; scale/bias were
        # pre-tiled to the (1, W*Co) lane layout in the wrapper.
        return jnp.maximum(acc * scale_ref[...] + bias_ref[...], 0.0)

    h1 = conv3x3_bn_relu(x, w1_ref, s1_ref, b1_ref, W * Co)     # (M, W*Co)
    h2 = conv3x3_bn_relu(h1, w2_ref, s2_ref, b2_ref, W * Co)    # (M, W*Co)

    # ---- y' output: lane-dense (B, H, W*Co) store (free reshape) -----------
    yout_ref[...] = h2.reshape(B, H, W * Co)

    # ---- conv_res (1x1, block-diag weight) + nearest upsample + residual ---
    res = jnp.dot(h2.astype(jnp.bfloat16), wr_ref[...],
                  preferred_element_type=jnp.float32) + br_ref[...]
    res = res.reshape(B, H, W * Cz)
    for p in range(s * s):
        zout_ref[:, p] = z_ref[:, p] + res


def frru_forward(y_nchw, z_nchw, kp, scale, b_tile=4):
    """y_nchw: (N, Cp, H, W); z_nchw: (N, Cz, H*scale, W*scale).  Returns
    (y_prime, z_prime) in NCHW, matching the PyTorch module."""
    N, Cp, H, W = y_nchw.shape
    _, Cz, Hs, Ws = z_nchw.shape
    Co = kp["s1"].shape[1] // W
    s = scale
    B = min(b_tile, N)
    assert N % B == 0, "batch must be divisible by the batch tile"

    # NCHW -> NHWC (+ phase split of z): layout plumbing only.  The trailing
    # (..., W, C) -> (..., W*C) merges are free reshapes and make every
    # HBM<->VMEM transfer lane-dense (last dim a multiple of 128 here).
    # TODO(synk): at production resolutions keep the model NHWC end-to-end so
    #             these full-resolution transpose passes disappear.
    y_dense = (jnp.transpose(y_nchw, (0, 2, 3, 1)).astype(jnp.float32)
               .reshape(N, H, W * Cp))
    z_phased = (jnp.transpose(z_nchw, (0, 2, 3, 1)).astype(jnp.float32)
                .reshape(N, H, s, W, s, Cz)
                .transpose(0, 2, 4, 1, 3, 5)
                .reshape(N, s * s, H, W * Cz))

    kern = functools.partial(_frru_kernel, B, H, W, s, Cp, Cz, Co)

    grid_spec = pltpu.PrefetchScalarGridSpec(
        num_scalar_prefetch=0,
        grid=(N // B,),
        in_specs=[
            pl.BlockSpec((B, H, W * Cp), lambda n: (n, 0, 0)),
            pl.BlockSpec((B, s * s, H, W * Cz), lambda n: (n, 0, 0, 0)),
            pl.BlockSpec((3, W * (Cp + Cz), W * Co), lambda n: (0, 0, 0)),
            pl.BlockSpec((1, W * Co), lambda n: (0, 0)),
            pl.BlockSpec((1, W * Co), lambda n: (0, 0)),
            pl.BlockSpec((3, W * Co, W * Co), lambda n: (0, 0, 0)),
            pl.BlockSpec((1, W * Co), lambda n: (0, 0)),
            pl.BlockSpec((1, W * Co), lambda n: (0, 0)),
            pl.BlockSpec((W * Co, W * Cz), lambda n: (0, 0)),
            pl.BlockSpec((1, W * Cz), lambda n: (0, 0)),
        ],
        out_specs=[
            pl.BlockSpec((B, H, W * Co), lambda n: (n, 0, 0)),
            pl.BlockSpec((B, s * s, H, W * Cz), lambda n: (n, 0, 0, 0)),
        ],
    )

    yp_dense, zp_phased = pl.pallas_call(
        kern,
        out_shape=(jax.ShapeDtypeStruct((N, H, W * Co), jnp.float32),
                   jax.ShapeDtypeStruct((N, s * s, H, W * Cz), jnp.float32)),
        grid_spec=grid_spec,
        input_output_aliases={1: 1},          # reuse the z buffer for z'
        compiler_params=pltpu.CompilerParams(
            dimension_semantics=("parallel",)),
    )(y_dense, z_phased,
      kp["w1"], kp["s1"], kp["b1"],
      kp["w2"], kp["s2"], kp["b2"],
      kp["wr"], kp["br"])

    # back to NCHW / full resolution (free reshapes + layout transposes).
    y_prime = jnp.transpose(yp_dense.reshape(N, H, W, Co), (0, 3, 1, 2))
    z_prime = (zp_phased.reshape(N, s, s, H, W, Cz)
               .transpose(0, 3, 1, 4, 2, 5)
               .reshape(N, Hs, Ws, Cz)
               .transpose(0, 3, 1, 2))
    return y_prime, z_prime


# ---------------- parameter setup (deterministic, synthetic) ----------------

def init_raw_params(key, Cp, Co, Cz, eps=1e-5):
    Cin1 = Cp + Cz
    ks = jax.random.split(key, 14)

    def nrm(k, shape, scale=0.1):
        return scale * jax.random.normal(k, shape, jnp.float32)

    return dict(
        W1=nrm(ks[0], (Co, Cin1, 3, 3)), b1=nrm(ks[1], (Co,)),
        g1=1.0 + nrm(ks[2], (Co,)), be1=nrm(ks[3], (Co,)),
        m1=nrm(ks[4], (Co,)),
        v1=1.0 + 0.1 * jax.random.uniform(ks[5], (Co,), jnp.float32),
        W2=nrm(ks[6], (Co, Co, 3, 3)), b2=nrm(ks[7], (Co,)),
        g2=1.0 + nrm(ks[8], (Co,)), be2=nrm(ks[9], (Co,)),
        m2=nrm(ks[10], (Co,)),
        v2=1.0 + 0.1 * jax.random.uniform(ks[11], (Co,), jnp.float32),
        Wr=nrm(ks[12], (Cz, Co, 1, 1)), br=nrm(ks[13], (Cz,)),
        eps=eps,
    )


def _banded_3x3(w_taps, W):
    """w_taps: (3, 3, Cin, Co) -> (3, W*Cin, W*Co) banded weights.

    Row index = w_in*Cin + ci, col index = w_out*Co + co.  The dx part of the
    3x3 stencil (and its zero padding at the w edges) lives in the band
    structure, so the kernel only loops over dy."""
    _, _, Cin, Co = w_taps.shape
    out = jnp.zeros((3, W, Cin, W, Co), w_taps.dtype)
    for kx in range(3):
        dx = kx - 1
        for w_out in range(W):
            w_in = w_out + dx
            if 0 <= w_in < W:
                out = out.at[:, w_in, :, w_out, :].set(w_taps[:, kx])
    return out.reshape(3, W * Cin, W * Co)


def _block_diag(w, W):
    """w: (Ci, Co) -> (W*Ci, W*Co) block-diagonal (per-pixel 1x1 conv)."""
    Ci, Co = w.shape
    out = jnp.zeros((W, Ci, W, Co), w.dtype)
    for i in range(W):
        out = out.at[i, :, i, :].set(w)
    return out.reshape(W * Ci, W * Co)


def pack_params(raw, Cp, Co, Cz, W):
    """Torch-layout (OIHW) params -> kernel layout: fold conv bias + BN into
    per-channel (scale, bias) tiled to the W*C lane layout, build banded 3x3
    weights (dx folded into the band) and a block-diagonal 1x1 weight, and
    cast matmul weights to bf16 (MXU-native)."""
    eps = raw["eps"]
    s1 = raw["g1"] / jnp.sqrt(raw["v1"] + eps)
    b1 = (raw["b1"] - raw["m1"]) * s1 + raw["be1"]
    s2 = raw["g2"] / jnp.sqrt(raw["v2"] + eps)
    b2 = (raw["b2"] - raw["m2"]) * s2 + raw["be2"]

    # OIHW -> (ky, kx, ci, co)
    w1 = jnp.transpose(raw["W1"], (2, 3, 1, 0))            # (3,3,Cp+Cz,Co)
    w2 = jnp.transpose(raw["W2"], (2, 3, 1, 0))            # (3,3,Co,Co)
    # x's lane layout is [y: w*Cp+cp | pooled z: w*Cz+cz], so build the banded
    # matrices for the y / z channel groups separately and stack them along
    # the contraction (row) axis.
    w1_banded = jnp.concatenate(
        [_banded_3x3(w1[:, :, :Cp, :], W),
         _banded_3x3(w1[:, :, Cp:, :], W)], axis=1)        # (3, W*(Cp+Cz), W*Co)
    w2_banded = _banded_3x3(w2, W)                         # (3, W*Co, W*Co)
    wr_diag = _block_diag(raw["Wr"][:, :, 0, 0].T, W)      # (W*Co, W*Cz)

    def tile_lanes(v, C):
        return jnp.tile(v.reshape(1, C), (1, W))           # lane w*C+c -> v[c]

    return dict(
        w1=w1_banded.astype(jnp.bfloat16),
        w2=w2_banded.astype(jnp.bfloat16),
        wr=wr_diag.astype(jnp.bfloat16),
        s1=tile_lanes(s1, Co), b1=tile_lanes(b1, Co),
        s2=tile_lanes(s2, Co), b2=tile_lanes(b2, Co),
        br=tile_lanes(raw["br"], Cz),
    )


# ---------------- pure-JAX reference (NCHW, mirrors the PyTorch code) -------

def frru_reference(y, z, raw, scale):
    eps = raw["eps"]
    N, Cp, H, W = y.shape
    Cz = z.shape[1]

    zp = z.reshape(N, Cz, H, scale, W, scale).max(axis=(3, 5))
    x = jnp.concatenate([y, zp], axis=1)

    def cbr(inp, Wc, bc, g, be, m, v):
        c = lax.conv_general_dilated(
            inp, Wc, (1, 1), ((1, 1), (1, 1)),
            dimension_numbers=("NCHW", "OIHW", "NCHW"),
            precision=lax.Precision.HIGHEST) + bc[None, :, None, None]
        c = ((c - m[None, :, None, None])
             / jnp.sqrt(v[None, :, None, None] + eps)
             * g[None, :, None, None] + be[None, :, None, None])
        return jnp.maximum(c, 0.0)

    h1 = cbr(x, raw["W1"], raw["b1"], raw["g1"], raw["be1"], raw["m1"], raw["v1"])
    h2 = cbr(h1, raw["W2"], raw["b2"], raw["g2"], raw["be2"], raw["m2"], raw["v2"])
    res = lax.conv_general_dilated(
        h2, raw["Wr"], (1, 1), ((0, 0), (0, 0)),
        dimension_numbers=("NCHW", "OIHW", "NCHW"),
        precision=lax.Precision.HIGHEST) + raw["br"][None, :, None, None]
    up = jnp.repeat(jnp.repeat(res, scale, axis=2), scale, axis=3)
    return h2, z + up


if __name__ == "__main__":
    key = jax.random.PRNGKey(0)
    k_par, k_y, k_z = jax.random.split(key, 3)

    # FRRU(prev_channels=16, out_channels=16, scale=2); Cz is fixed at 32 by
    # the module.  N=8 with b_tile=4 gives 2 parallel grid steps (2 TCs on
    # v7x) and lane-dense 128/256/384-wide slabs (W*Cp=128, W*Cz=256).
    N, Cp, Co, Cz, scale = 8, 16, 16, 32, 2
    H = W = 8
    y = jax.random.normal(k_y, (N, Cp, H, W), jnp.float32)
    z = jax.random.normal(k_z, (N, Cz, H * scale, W * scale), jnp.float32)

    raw = init_raw_params(k_par, Cp, Co, Cz)
    kparams = pack_params(raw, Cp, Co, Cz, W)

    y_prime, z_prime = frru_forward(y, z, kparams, scale, b_tile=4)
    jax.block_until_ready((y_prime, z_prime))

    y_ref, z_ref = frru_reference(y, z, raw, scale)
    assert y_prime.shape == (N, Co, H, W)
    assert z_prime.shape == z.shape
    # bf16 MXU matmuls vs. an fp32-HIGHEST reference through two stacked 3x3
    # convs -> tolerance loosened accordingly (real bugs produce O(1) errors).
    assert jnp.allclose(y_prime, y_ref, atol=1e-1, rtol=1e-1)
    assert jnp.allclose(z_prime, z_ref, atol=1e-1, rtol=1e-1)

    print("KERNEL_OK")
</pallas_src>

<mosaic_0001>
module attributes {stable_mosaic.version = 11 : i64} {
  func.func @_frru_kernel(%arg0: i32, %arg1: memref<4x8x128xf32, #tpu.memory_space<vmem>>, %arg2: memref<4x4x8x256xf32, #tpu.memory_space<vmem>>, %arg3: memref<3x384x128xbf16, #tpu.memory_space<vmem>>, %arg4: memref<1x128xf32, #tpu.memory_space<vmem>>, %arg5: memref<1x128xf32, #tpu.memory_space<vmem>>, %arg6: memref<3x128x128xbf16, #tpu.memory_space<vmem>>, %arg7: memref<1x128xf32, #tpu.memory_space<vmem>>, %arg8: memref<1x128xf32, #tpu.memory_space<vmem>>, %arg9: memref<128x256xbf16, #tpu.memory_space<vmem>>, %arg10: memref<1x256xf32, #tpu.memory_space<vmem>>, %arg11: memref<4x8x128xf32, #tpu.memory_space<vmem>>, %arg12: memref<4x4x8x256xf32, #tpu.memory_space<vmem>>) attributes {dimension_semantics = [#tpu.dimension_semantics<parallel>], iteration_bounds = array<i64: 2>, scalar_prefetch = 0 : i64, scratch_operands = 0 : i64, tpu.core_type = #tpu.core_type<tc>, window_params = [{transform_indices = @transform_0, window_bounds = array<i64: 4, 8, 128>}, {transform_indices = @transform_1, window_bounds = array<i64: 4, 4, 8, 256>}, {pipeline_mode = #tpu.pipeline_mode<synchronous>, transform_indices = @transform_2, window_bounds = array<i64: 3, 384, 128>}, {pipeline_mode = #tpu.pipeline_mode<synchronous>, transform_indices = @transform_3, window_bounds = array<i64: 1, 128>}, {pipeline_mode = #tpu.pipeline_mode<synchronous>, transform_indices = @transform_4, window_bounds = array<i64: 1, 128>}, {pipeline_mode = #tpu.pipeline_mode<synchronous>, transform_indices = @transform_5, window_bounds = array<i64: 3, 128, 128>}, {pipeline_mode = #tpu.pipeline_mode<synchronous>, transform_indices = @transform_6, window_bounds = array<i64: 1, 128>}, {pipeline_mode = #tpu.pipeline_mode<synchronous>, transform_indices = @transform_7, window_bounds = array<i64: 1, 128>}, {pipeline_mode = #tpu.pipeline_mode<synchronous>, transform_indices = @transform_8, window_bounds = array<i64: 128, 256>}, {pipeline_mode = #tpu.pipeline_mode<synchronous>, transform_indices = @transform_9, window_bounds = array<i64: 1, 256>}, {transform_indices = @transform_10, window_bounds = array<i64: 4, 8, 128>}, {transform_indices = @transform_11, window_bounds = array<i64: 4, 4, 8, 256>}]} {
    %c0 = arith.constant 0 : index
    %c0_0 = arith.constant 0 : index
    %c0_1 = arith.constant 0 : index
    %c0_2 = arith.constant 0 : index
    %0 = vector.load %arg2[%c0, %c0_0, %c0_1, %c0_2] : memref<4x4x8x256xf32, #tpu.memory_space<vmem>>, vector<4x1x8x256xf32>
    %1 = vector.shape_cast %0 : vector<4x1x8x256xf32> to vector<4x8x256xf32>
    %c0_3 = arith.constant 0 : index
    %c1 = arith.constant 1 : index
    %c0_4 = arith.constant 0 : index
    %c0_5 = arith.constant 0 : index
    %2 = vector.load %arg2[%c0_3, %c1, %c0_4, %c0_5] : memref<4x4x8x256xf32, #tpu.memory_space<vmem>>, vector<4x1x8x256xf32>
    %3 = vector.shape_cast %2 : vector<4x1x8x256xf32> to vector<4x8x256xf32>
    %4 = arith.maximumf %1, %3 : vector<4x8x256xf32>
    %c0_6 = arith.constant 0 : index
    %c2 = arith.constant 2 : index
    %c0_7 = arith.constant 0 : index
    %c0_8 = arith.constant 0 : index
    %5 = vector.load %arg2[%c0_6, %c2, %c0_7, %c0_8] : memref<4x4x8x256xf32, #tpu.memory_space<vmem>>, vector<4x1x8x256xf32>
    %6 = vector.shape_cast %5 : vector<4x1x8x256xf32> to vector<4x8x256xf32>
    %7 = arith.maximumf %4, %6 : vector<4x8x256xf32>
    %c0_9 = arith.constant 0 : index
    %c3 = arith.constant 3 : index
    %c0_10 = arith.constant 0 : index
    %c0_11 = arith.constant 0 : index
    %8 = vector.load %arg2[%c0_9, %c3, %c0_10, %c0_11] : memref<4x4x8x256xf32, #tpu.memory_space<vmem>>, vector<4x1x8x256xf32>
    %9 = vector.shape_cast %8 : vector<4x1x8x256xf32> to vector<4x8x256xf32>
    %10 = arith.maximumf %7, %9 : vector<4x8x256xf32>
    %c0_12 = arith.constant 0 : index
    %c0_13 = arith.constant 0 : index
    %c0_14 = arith.constant 0 : index
    %11 = vector.load %arg1[%c0_12, %c0_13, %c0_14] : memref<4x8x128xf32, #tpu.memory_space<vmem>>, vector<4x8x128xf32>
    %12 = vector.shape_cast %11 : vector<4x8x128xf32> to vector<32x128xf32>
    %13 = vector.shape_cast %10 : vector<4x8x256xf32> to vector<32x256xf32>
    %14 = tpu.concatenate %12, %13 in 1 : vector<32x128xf32>, vector<32x256xf32> -> vector<32x384xf32>
    %15 = tpu.iota {dimensions = array<i32: 0>} : vector<32x1xi32>
    %c8_i32 = arith.constant 8 : i32
    %c0_i32 = arith.constant 0 : i32
    %16 = arith.cmpi eq, %c8_i32, %c0_i32 : i32
    %c1_i32 = arith.constant 1 : i32
    %17 = arith.select %16, %c1_i32, %c8_i32 : i32
    %18 = vector.broadcast %17 : i32 to vector<32x1xi32>
    %19 = arith.remsi %15, %18 : vector<32x1xi32>
    %c0_i32_15 = arith.constant 0 : i32
    %20 = vector.broadcast %c0_i32_15 : i32 to vector<32x1xi32>
    %21 = arith.cmpi ne, %19, %20 : vector<32x1xi32>
    %c0_i32_16 = arith.constant 0 : i32
    %22 = vector.broadcast %c0_i32_16 : i32 to vector<32x1xi32>
    %23 = arith.cmpi slt, %19, %22 : vector<32x1xi32>
    %c0_i32_17 = arith.constant 0 : i32
    %24 = arith.cmpi slt, %17, %c0_i32_17 : i32
    %25 = vector.broadcast %24 : i1 to vector<32x1xi1>
    %26 = vector.broadcast %25 : vector<32x1xi1> to vector<32x1xi1>
    %27 = arith.xori %23, %26 : vector<32x1xi1>
    %28 = arith.andi %27, %21 : vector<32x1xi1>
    %29 = vector.broadcast %17 : i32 to vector<32x1xi32>
    %30 = arith.addi %19, %29 : vector<32x1xi32>
    %31 = arith.select %28, %30, %19 : vector<32x1xi1>, vector<32x1xi32>
    %cst = arith.constant 0.000000e+00 : f32
    %32 = vector.broadcast %cst : f32 to vector<32x128xf32>
    %c1_i32_18 = arith.constant 1 : i32
    %33 = tpu.dynamic_rotate %14 by %c1_i32_18 dim 0 : vector<32x384xf32>, i32 -> vector<32x384xf32>
    %c-1_i32 = arith.constant -1 : i32
    %34 = vector.broadcast %c-1_i32 : i32 to vector<32x1xi32>
    %35 = arith.addi %31, %34 : vector<32x1xi32>
    %c0_i32_19 = arith.constant 0 : i32
    %36 = vector.broadcast %c0_i32_19 : i32 to vector<32x1xi32>
    %37 = arith.cmpi sge, %35, %36 : vector<32x1xi32>
    %c-1_i32_20 = arith.constant -1 : i32
    %38 = vector.broadcast %c-1_i32_20 : i32 to vector<32x1xi32>
    %39 = arith.addi %31, %38 : vector<32x1xi32>
    %c8_i32_21 = arith.constant 8 : i32
    %40 = vector.broadcast %c8_i32_21 : i32 to vector<32x1xi32>
    %41 = arith.cmpi slt, %39, %40 : vector<32x1xi32>
    %42 = arith.andi %37, %41 : vector<32x1xi1>
    %cst_22 = arith.constant 0.000000e+00 : f32
    %43 = vector.shape_cast %42 : vector<32x1xi1> to vector<32x1xi1>
    %44 = vector.broadcast %43 : vector<32x1xi1> to vector<32x384xi1>
    %45 = vector.broadcast %cst_22 : f32 to vector<32x384xf32>
    %46 = arith.select %44, %33, %45 : vector<32x384xi1>, vector<32x384xf32>
    %47 = arith.truncf %46 : vector<32x384xf32> to vector<32x384xbf16>
    %c0_23 = arith.constant 0 : index
    %c0_24 = arith.constant 0 : index
    %c0_25 = arith.constant 0 : index
    %48 = vector.load %arg3[%c0_23, %c0_24, %c0_25] : memref<3x384x128xbf16, #tpu.memory_space<vmem>>, vector<1x384x128xbf16>
    %49 = vector.shape_cast %48 : vector<1x384x128xbf16> to vector<384x128xbf16>
    %cst_26 = arith.constant dense<0.000000e+00> : vector<32x128xf32>
    %50 = tpu.matmul %47, %49, %cst_26 {dimension_numbers = #tpu.dot_dimension_numbers<[1], [0], [0], [1], [0, 0, 1, 1], [], []>} : vector<32x384xbf16>, vector<384x128xbf16>, vector<32x128xf32> -> vector<32x128xf32>
    %51 = arith.addf %32, %50 : vector<32x128xf32>
    %52 = arith.truncf %14 : vector<32x384xf32> to vector<32x384xbf16>
    %c1_27 = arith.constant 1 : index
    %c0_28 = arith.constant 0 : index
    %c0_29 = arith.constant 0 : index
    %53 = vector.load %arg3[%c1_27, %c0_28, %c0_29] : memref<3x384x128xbf16, #tpu.memory_space<vmem>>, vector<1x384x128xbf16>
    %54 = vector.shape_cast %53 : vector<1x384x128xbf16> to vector<384x128xbf16>
    %cst_30 = arith.constant dense<0.000000e+00> : vector<32x128xf32>
    %55 = tpu.matmul %52, %54, %cst_30 {dimension_numbers = #tpu.dot_dimension_numbers<[1], [0], [0], [1], [0, 0, 1, 1], [], []>} : vector<32x384xbf16>, vector<384x128xbf16>, vector<32x128xf32> -> vector<32x128xf32>
    %56 = arith.addf %51, %55 : vector<32x128xf32>
    %c31_i32 = arith.constant 31 : i32
    %57 = tpu.dynamic_rotate %14 by %c31_i32 dim 0 : vector<32x384xf32>, i32 -> vector<32x384xf32>
    %c1_i32_31 = arith.constant 1 : i32
    %58 = vector.broadcast %c1_i32_31 : i32 to vector<32x1xi32>
    %59 = arith.addi %31, %58 : vector<32x1xi32>
    %c0_i32_32 = arith.constant 0 : i32
    %60 = vector.broadcast %c0_i32_32 : i32 to vector<32x1xi32>
    %61 = arith.cmpi sge, %59, %60 : vector<32x1xi32>
    %c1_i32_33 = arith.constant 1 : i32
    %62 = vector.broadcast %c1_i32_33 : i32 to vector<32x1xi32>
    %63 = arith.addi %31, %62 : vector<32x1xi32>
    %c8_i32_34 = arith.constant 8 : i32
    %64 = vector.broadcast %c8_i32_34 : i32 to vector<32x1xi32>
    %65 = arith.cmpi slt, %63, %64 : vector<32x1xi32>
    %66 = arith.andi %61, %65 : vector<32x1xi1>
    %cst_35 = arith.constant 0.000000e+00 : f32
    %67 = vector.shape_cast %66 : vector<32x1xi1> to vector<32x1xi1>
    %68 = vector.broadcast %67 : vector<32x1xi1> to vector<32x384xi1>
    %69 = vector.broadcast %cst_35 : f32 to vector<32x384xf32>
    %70 = arith.select %68, %57, %69 : vector<32x384xi1>, vector<32x384xf32>
    %71 = arith.truncf %70 : vector<32x384xf32> to vector<32x384xbf16>
    %c2_36 = arith.constant 2 : index
    %c0_37 = arith.constant 0 : index
    %c0_38 = arith.constant 0 : index
    %72 = vector.load %arg3[%c2_36, %c0_37, %c0_38] : memref<3x384x128xbf16, #tpu.memory_space<vmem>>, vector<1x384x128xbf16>
    %73 = vector.shape_cast %72 : vector<1x384x128xbf16> to vector<384x128xbf16>
    %cst_39 = arith.constant dense<0.000000e+00> : vector<32x128xf32>
    %74 = tpu.matmul %71, %73, %cst_39 {dimension_numbers = #tpu.dot_dimension_numbers<[1], [0], [0], [1], [0, 0, 1, 1], [], []>} : vector<32x384xbf16>, vector<384x128xbf16>, vector<32x128xf32> -> vector<32x128xf32>
    %75 = arith.addf %56, %74 : vector<32x128xf32>
    %c0_40 = arith.constant 0 : index
    %c0_41 = arith.constant 0 : index
    %76 = vector.load %arg4[%c0_40, %c0_41] : memref<1x128xf32, #tpu.memory_space<vmem>>, vector<1x128xf32>
    %77 = vector.broadcast %76 : vector<1x128xf32> to vector<32x128xf32>
    %78 = arith.mulf %75, %77 : vector<32x128xf32>
    %c0_42 = arith.constant 0 : index
    %c0_43 = arith.constant 0 : index
    %79 = vector.load %arg5[%c0_42, %c0_43] : memref<1x128xf32, #tpu.memory_space<vmem>>, vector<1x128xf32>
    %80 = vector.broadcast %79 : vector<1x128xf32> to vector<32x128xf32>
    %81 = arith.addf %78, %80 : vector<32x128xf32>
    %cst_44 = arith.constant 0.000000e+00 : f32
    %82 = vector.broadcast %cst_44 : f32 to vector<32x128xf32>
    %83 = arith.maximumf %81, %82 : vector<32x128xf32>
    %cst_45 = arith.constant 0.000000e+00 : f32
    %84 = vector.broadcast %cst_45 : f32 to vector<32x128xf32>
    %c1_i32_46 = arith.constant 1 : i32
    %85 = tpu.dynamic_rotate %83 by %c1_i32_46 dim 0 : vector<32x128xf32>, i32 -> vector<32x128xf32>
    %c-1_i32_47 = arith.constant -1 : i32
    %86 = vector.broadcast %c-1_i32_47 : i32 to vector<32x1xi32>
    %87 = arith.addi %31, %86 : vector<32x1xi32>
    %c0_i32_48 = arith.constant 0 : i32
    %88 = vector.broadcast %c0_i32_48 : i32 to vector<32x1xi32>
    %89 = arith.cmpi sge, %87, %88 : vector<32x1xi32>
    %c-1_i32_49 = arith.constant -1 : i32
    %90 = vector.broadcast %c-1_i32_49 : i32 to vector<32x1xi32>
    %91 = arith.addi %31, %90 : vector<32x1xi32>
    %c8_i32_50 = arith.constant 8 : i32
    %92 = vector.broadcast %c8_i32_50 : i32 to vector<32x1xi32>
    %93 = arith.cmpi slt, %91, %92 : vector<32x1xi32>
    %94 = arith.andi %89, %93 : vector<32x1xi1>
    %cst_51 = arith.constant 0.000000e+00 : f32
    %95 = vector.shape_cast %94 : vector<32x1xi1> to vector<32x1xi1>
    %96 = vector.broadcast %95 : vector<32x1xi1> to vector<32x128xi1>
    %97 = vector.broadcast %cst_51 : f32 to vector<32x128xf32>
    %98 = arith.select %96, %85, %97 : vector<32x128xi1>, vector<32x128xf32>
    %99 = arith.truncf %98 : vector<32x128xf32> to vector<32x128xbf16>
    %c0_52 = arith.constant 0 : index
    %c0_53 = arith.constant 0 : index
    %c0_54 = arith.constant 0 : index
    %100 = vector.load %arg6[%c0_52, %c0_53, %c0_54] : memref<3x128x128xbf16, #tpu.memory_space<vmem>>, vector<1x128x128xbf16>
    %101 = vector.shape_cast %100 : vector<1x128x128xbf16> to vector<128x128xbf16>
    %cst_55 = arith.constant dense<0.000000e+00> : vector<32x128xf32>
    %102 = tpu.matmul %99, %101, %cst_55 {dimension_numbers = #tpu.dot_dimension_numbers<[1], [0], [0], [1], [0, 0, 1, 1], [], []>} : vector<32x128xbf16>, vector<128x128xbf16>, vector<32x128xf32> -> vector<32x128xf32>
    %103 = arith.addf %84, %102 : vector<32x128xf32>
    %104 = arith.truncf %83 : vector<32x128xf32> to vector<32x128xbf16>
    %c1_56 = arith.constant 1 : index
    %c0_57 = arith.constant 0 : index
    %c0_58 = arith.constant 0 : index
    %105 = vector.load %arg6[%c1_56, %c0_57, %c0_58] : memref<3x128x128xbf16, #tpu.memory_space<vmem>>, vector<1x128x128xbf16>
    %106 = vector.shape_cast %105 : vector<1x128x128xbf16> to vector<128x128xbf16>
    %cst_59 = arith.constant dense<0.000000e+00> : vector<32x128xf32>
    %107 = tpu.matmul %104, %106, %cst_59 {dimension_numbers = #tpu.dot_dimension_numbers<[1], [0], [0], [1], [0, 0, 1, 1], [], []>} : vector<32x128xbf16>, vector<128x128xbf16>, vector<32x128xf32> -> vector<32x128xf32>
    %108 = arith.addf %103, %107 : vector<32x128xf32>
    %c31_i32_60 = arith.constant 31 : i32
    %109 = tpu.dynamic_rotate %83 by %c31_i32_60 dim 0 : vector<32x128xf32>, i32 -> vector<32x128xf32>
    %c1_i32_61 = arith.constant 1 : i32
    %110 = vector.broadcast %c1_i32_61 : i32 to vector<32x1xi32>
    %111 = arith.addi %31, %110 : vector<32x1xi32>
    %c0_i32_62 = arith.constant 0 : i32
    %112 = vector.broadcast %c0_i32_62 : i32 to vector<32x1xi32>
    %113 = arith.cmpi sge, %111, %112 : vector<32x1xi32>
    %c1_i32_63 = arith.constant 1 : i32
    %114 = vector.broadcast %c1_i32_63 : i32 to vector<32x1xi32>
    %115 = arith.addi %31, %114 : vector<32x1xi32>
    %c8_i32_64 = arith.constant 8 : i32
    %116 = vector.broadcast %c8_i32_64 : i32 to vector<32x1xi32>
    %117 = arith.cmpi slt, %115, %116 : vector<32x1xi32>
    %118 = arith.andi %113, %117 : vector<32x1xi1>
    %cst_65 = arith.constant 0.000000e+00 : f32
    %119 = vector.shape_cast %118 : vector<32x1xi1> to vector<32x1xi1>
    %120 = vector.broadcast %119 : vector<32x1xi1> to vector<32x128xi1>
    %121 = vector.broadcast %cst_65 : f32 to vector<32x128xf32>
    %122 = arith.select %120, %109, %121 : vector<32x128xi1>, vector<32x128xf32>
    %123 = arith.truncf %122 : vector<32x128xf32> to vector<32x128xbf16>
    %c2_66 = arith.constant 2 : index
    %c0_67 = arith.constant 0 : index
    %c0_68 = arith.constant 0 : index
    %124 = vector.load %arg6[%c2_66, %c0_67, %c0_68] : memref<3x128x128xbf16, #tpu.memory_space<vmem>>, vector<1x128x128xbf16>
    %125 = vector.shape_cast %124 : vector<1x128x128xbf16> to vector<128x128xbf16>
    %cst_69 = arith.constant dense<0.000000e+00> : vector<32x128xf32>
    %126 = tpu.matmul %123, %125, %cst_69 {dimension_numbers = #tpu.dot_dimension_numbers<[1], [0], [0], [1], [0, 0, 1, 1], [], []>} : vector<32x128xbf16>, vector<128x128xbf16>, vector<32x128xf32> -> vector<32x128xf32>
    %127 = arith.addf %108, %126 : vector<32x128xf32>
    %c0_70 = arith.constant 0 : index
    %c0_71 = arith.constant 0 : index
    %128 = vector.load %arg7[%c0_70, %c0_71] : memref<1x128xf32, #tpu.memory_space<vmem>>, vector<1x128xf32>
    %129 = vector.broadcast %128 : vector<1x128xf32> to vector<32x128xf32>
    %130 = arith.mulf %127, %129 : vector<32x128xf32>
    %c0_72 = arith.constant 0 : index
    %c0_73 = arith.constant 0 : index
    %131 = vector.load %arg8[%c0_72, %c0_73] : memref<1x128xf32, #tpu.memory_space<vmem>>, vector<1x128xf32>
    %132 = vector.broadcast %131 : vector<1x128xf32> to vector<32x128xf32>
    %133 = arith.addf %130, %132 : vector<32x128xf32>
    %cst_74 = arith.constant 0.000000e+00 : f32
    %134 = vector.broadcast %cst_74 : f32 to vector<32x128xf32>
    %135 = arith.maximumf %133, %134 : vector<32x128xf32>
    %136 = vector.shape_cast %135 : vector<32x128xf32> to vector<4x8x128xf32>
    %c0_75 = arith.constant 0 : index
    %c0_76 = arith.constant 0 : index
    %c0_77 = arith.constant 0 : index
    %137 = vector.load %arg11[%c0_75, %c0_76, %c0_77] : memref<4x8x128xf32, #tpu.memory_space<vmem>>, vector<4x8x128xf32>
    tpu.vector_store %arg11[%c0_75, %c0_76, %c0_77], %136 {strides = array<i32>} : memref<4x8x128xf32, #tpu.memory_space<vmem>>, vector<4x8x128xf32>,
    %138 = arith.truncf %135 : vector<32x128xf32> to vector<32x128xbf16>
    %c0_78 = arith.constant 0 : index
    %c0_79 = arith.constant 0 : index
    %139 = vector.load %arg9[%c0_78, %c0_79] : memref<128x256xbf16, #tpu.memory_space<vmem>>, vector<128x256xbf16>
    %cst_80 = arith.constant dense<0.000000e+00> : vector<32x256xf32>
    %140 = tpu.matmul %138, %139, %cst_80 {dimension_numbers = #tpu.dot_dimension_numbers<[1], [0], [0], [1], [0, 0, 1, 1], [], []>} : vector<32x128xbf16>, vector<128x256xbf16>, vector<32x256xf32> -> vector<32x256xf32>
    %c0_81 = arith.constant 0 : index
    %c0_82 = arith.constant 0 : index
    %141 = vector.load %arg10[%c0_81, %c0_82] : memref<1x256xf32, #tpu.memory_space<vmem>>, vector<1x256xf32>
    %142 = vector.broadcast %141 : vector<1x256xf32> to vector<32x256xf32>
    %143 = arith.addf %140, %142 : vector<32x256xf32>
    %144 = vector.shape_cast %143 : vector<32x256xf32> to vector<4x8x256xf32>
    %c0_83 = arith.constant 0 : index
    %c0_84 = arith.constant 0 : index
    %c0_85 = arith.constant 0 : index
    %c0_86 = arith.constant 0 : index
    %145 = vector.load %arg2[%c0_83, %c0_84, %c0_85, %c0_86] : memref<4x4x8x256xf32, #tpu.memory_space<vmem>>, vector<4x1x8x256xf32>
    %146 = vector.shape_cast %145 : vector<4x1x8x256xf32> to vector<4x8x256xf32>
    %147 = arith.addf %146, %144 : vector<4x8x256xf32>
    %c0_87 = arith.constant 0 : index
    %c0_88 = arith.constant 0 : index
    %c0_89 = arith.constant 0 : index
    %c0_90 = arith.constant 0 : index
    %148 = vector.load %arg12[%c0_87, %c0_88, %c0_89, %c0_90] : memref<4x4x8x256xf32, #tpu.memory_space<vmem>>, vector<4x1x8x256xf32>
    %149 = vector.shape_cast %148 : vector<4x1x8x256xf32> to vector<4x8x256xf32>
    %150 = vector.shape_cast %147 : vector<4x8x256xf32> to vector<4x1x8x256xf32>
    tpu.vector_store %arg12[%c0_87, %c0_88, %c0_89, %c0_90], %150 {strides = array<i32>} : memref<4x4x8x256xf32, #tpu.memory_space<vmem>>, vector<4x1x8x256xf32>,
    %c0_91 = arith.constant 0 : index
    %c1_92 = arith.constant 1 : index
    %c0_93 = arith.constant 0 : index
    %c0_94 = arith.constant 0 : index
    %151 = vector.load %arg2[%c0_91, %c1_92, %c0_93, %c0_94] : memref<4x4x8x256xf32, #tpu.memory_space<vmem>>, vector<4x1x8x256xf32>
    %152 = vector.shape_cast %151 : vector<4x1x8x256xf32> to vector<4x8x256xf32>
    %153 = arith.addf %152, %144 : vector<4x8x256xf32>
    %c0_95 = arith.constant 0 : index
    %c1_96 = arith.constant 1 : index
    %c0_97 = arith.constant 0 : index
    %c0_98 = arith.constant 0 : index
    %154 = vector.load %arg12[%c0_95, %c1_96, %c0_97, %c0_98] : memref<4x4x8x256xf32, #tpu.memory_space<vmem>>, vector<4x1x8x256xf32>
    %155 = vector.shape_cast %154 : vector<4x1x8x256xf32> to vector<4x8x256xf32>
    %156 = vector.shape_cast %153 : vector<4x8x256xf32> to vector<4x1x8x256xf32>
    tpu.vector_store %arg12[%c0_95, %c1_96, %c0_97, %c0_98], %156 {strides = array<i32>} : memref<4x4x8x256xf32, #tpu.memory_space<vmem>>, vector<4x1x8x256xf32>,
    %c0_99 = arith.constant 0 : index
    %c2_100 = arith.constant 2 : index
    %c0_101 = arith.constant 0 : index
    %c0_102 = arith.constant 0 : index
    %157 = vector.load %arg2[%c0_99, %c2_100, %c0_101, %c0_102] : memref<4x4x8x256xf32, #tpu.memory_space<vmem>>, vector<4x1x8x256xf32>
    %158 = vector.shape_cast %157 : vector<4x1x8x256xf32> to vector<4x8x256xf32>
    %159 = arith.addf %158, %144 : vector<4x8x256xf32>
    %c0_103 = arith.constant 0 : index
    %c2_104 = arith.constant 2 : index
    %c0_105 = arith.constant 0 : index
    %c0_106 = arith.constant 0 : index
    %160 = vector.load %arg12[%c0_103, %c2_104, %c0_105, %c0_106] : memref<4x4x8x256xf32, #tpu.memory_space<vmem>>, vector<4x1x8x256xf32>
    %161 = vector.shape_cast %160 : vector<4x1x8x256xf32> to vector<4x8x256xf32>
    %162 = vector.shape_cast %159 : vector<4x8x256xf32> to vector<4x1x8x256xf32>
    tpu.vector_store %arg12[%c0_103, %c2_104, %c0_105, %c0_106], %162 {strides = array<i32>} : memref<4x4x8x256xf32, #tpu.memory_space<vmem>>, vector<4x1x8x256xf32>,
    %c0_107 = arith.constant 0 : index
    %c3_108 = arith.constant 3 : index
    %c0_109 = arith.constant 0 : index
    %c0_110 = arith.constant 0 : index
    %163 = vector.load %arg2[%c0_107, %c3_108, %c0_109, %c0_110] : memref<4x4x8x256xf32, #tpu.memory_space<vmem>>, vector<4x1x8x256xf32>
    %164 = vector.shape_cast %163 : vector<4x1x8x256xf32> to vector<4x8x256xf32>
    %165 = arith.addf %164, %144 : vector<4x8x256xf32>
    %c0_111 = arith.constant 0 : index
    %c3_112 = arith.constant 3 : index
    %c0_113 = arith.constant 0 : index
    %c0_114 = arith.constant 0 : index
    %166 = vector.load %arg12[%c0_111, %c3_112, %c0_113, %c0_114] : memref<4x4x8x256xf32, #tpu.memory_space<vmem>>, vector<4x1x8x256xf32>
    %167 = vector.shape_cast %166 : vector<4x1x8x256xf32> to vector<4x8x256xf32>
    %168 = vector.shape_cast %165 : vector<4x8x256xf32> to vector<4x1x8x256xf32>
    tpu.vector_store %arg12[%c0_111, %c3_112, %c0_113, %c0_114], %168 {strides = array<i32>} : memref<4x4x8x256xf32, #tpu.memory_space<vmem>>, vector<4x1x8x256xf32>,
    return
  }
  func.func @transform_0(%arg0: i32) -> (i32, i32, i32) {
    %c0_i32 = arith.constant 0 : i32
    %c0_i32_0 = arith.constant 0 : i32
    %c0_i32_1 = arith.constant 0 : i32
    return %arg0, %c0_i32, %c0_i32_0 : i32, i32, i32
  }
  func.func @transform_1(%arg0: i32) -> (i32, i32, i32, i32) {
    %c0_i32 = arith.constant 0 : i32
    %c0_i32_0 = arith.constant 0 : i32
    %c0_i32_1 = arith.constant 0 : i32
    %c0_i32_2 = arith.constant 0 : i32
    return %arg0, %c0_i32, %c0_i32_0, %c0_i32_1 : i32, i32, i32, i32
  }
  func.func @transform_2(%arg0: i32) -> (i32, i32, i32) {
    %c0_i32 = arith.constant 0 : i32
    %c0_i32_0 = arith.constant 0 : i32
    %c0_i32_1 = arith.constant 0 : i32
    %c0_i32_2 = arith.constant 0 : i32
    return %c0_i32, %c0_i32_0, %c0_i32_1 : i32, i32, i32
  }
  func.func @transform_3(%arg0: i32) -> (i32, i32) {
    %c0_i32 = arith.constant 0 : i32
    %c0_i32_0 = arith.constant 0 : i32
    %c0_i32_1 = arith.constant 0 : i32
    return %c0_i32, %c0_i32_0 : i32, i32
  }
  func.func @transform_4(%arg0: i32) -> (i32, i32) {
    %c0_i32 = arith.constant 0 : i32
    %c0_i32_0 = arith.constant 0 : i32
    %c0_i32_1 = arith.constant 0 : i32
    return %c0_i32, %c0_i32_0 : i32, i32
  }
  func.func @transform_5(%arg0: i32) -> (i32, i32, i32) {
    %c0_i32 = arith.constant 0 : i32
    %c0_i32_0 = arith.constant 0 : i32
    %c0_i32_1 = arith.constant 0 : i32
    %c0_i32_2 = arith.constant 0 : i32
    return %c0_i32, %c0_i32_0, %c0_i32_1 : i32, i32, i32
  }
  func.func @transform_6(%arg0: i32) -> (i32, i32) {
    %c0_i32 = arith.constant 0 : i32
    %c0_i32_0 = arith.constant 0 : i32
    %c0_i32_1 = arith.constant 0 : i32
    return %c0_i32, %c0_i32_0 : i32, i32
  }
  func.func @transform_7(%arg0: i32) -> (i32, i32) {
    %c0_i32 = arith.constant 0 : i32
    %c0_i32_0 = arith.constant 0 : i32
    %c0_i32_1 = arith.constant 0 : i32
    return %c0_i32, %c0_i32_0 : i32, i32
  }
  func.func @transform_8(%arg0: i32) -> (i32, i32) {
    %c0_i32 = arith.constant 0 : i32
    %c0_i32_0 = arith.constant 0 : i32
    %c0_i32_1 = arith.constant 0 : i32
    return %c0_i32, %c0_i32_0 : i32, i32
  }
  func.func @transform_9(%arg0: i32) -> (i32, i32) {
    %c0_i32 = arith.constant 0 : i32
    %c0_i32_0 = arith.constant 0 : i32
    %c0_i32_1 = arith.constant 0 : i32
    return %c0_i32, %c0_i32_0 : i32, i32
  }
  func.func @transform_10(%arg0: i32) -> (i32, i32, i32) {
    %c0_i32 = arith.constant 0 : i32
    %c0_i32_0 = arith.constant 0 : i32
    %c0_i32_1 = arith.constant 0 : i32
    return %arg0, %c0_i32, %c0_i32_0 : i32, i32, i32
  }
  func.func @transform_11(%arg0: i32) -> (i32, i32, i32, i32) {
    %c0_i32 = arith.constant 0 : i32
    %c0_i32_0 = arith.constant 0 : i32
    %c0_i32_1 = arith.constant 0 : i32
    %c0_i32_2 = arith.constant 0 : i32
    return %arg0, %c0_i32, %c0_i32_0, %c0_i32_1 : i32, i32, i32, i32
  }
}

</mosaic_0001>

<bundles_post_ra>
// kernel: tpu_custom_call.1
= control target key start
LH: loop header
LB: loop body
LE: loop exit
PB: predicated region body
PF: predicated region fallthrough
CT: control target
= control target key end

     0   :  { %17 = vsyncpa [#allocation3], 0  ;;  %s4418_s0 = inlined_call_operand.vmem [shape: f32[8,8,128], index: 0, kind: input, shape index: {}]   ;;  %s4419_s1 = inlined_call_operand.hbm [shape: f32[8,4,8,256], index: 1, kind: input, shape index: {}, may-alias: {1,11}]   ;;  %s4420_s2 = inlined_call_operand.vmem [shape: bf16[3,384,128], index: 2, kind: input, shape index: {}]   ;;  %s4421_s3 = inlined_call_operand.vmem [shape: f32[1,128], index: 3, kind: input, shape index: {}]   ;;  %s4422_s4 = inlined_call_operand.vmem [shape: f32[1,128], index: 4, kind: input, shape index: {}]   ;;  %s4423_s5 = inlined_call_operand.vmem [shape: bf16[3,128,128], index: 5, kind: input, shape index: {}]   ;;  %s4424_s6 = inlined_call_operand.vmem [shape: f32[1,128], index: 6, kind: input, shape index: {}]   ;;  %s4425_s7 = inlined_call_operand.vmem [shape: f32[1,128], index: 7, kind: input, shape index: {}]   ;;  %s4426_s8 = inlined_call_operand.vmem [shape: bf16[128,256], index: 8, kind: input, shape index: {}]   ;;  %s4427_s9 = inlined_call_operand.vmem [shape: f32[1,256], index: 9, kind: input, shape index: {}]   ;;  %s4428_s10 = inlined_call_operand.hbm [shape: f32[8,8,128], index: 10, kind: output, shape index: {0}]   ;;  %s4429_s11 = inlined_call_operand.hbm [shape: f32[8,4,8,256], index: 11, kind: output, shape index: {1}, may-alias: {1,11}]  }
   0x1   :  { %19 = vsyncpa [#allocation3 + $0x1], 0 }
   0x2   :  { %20 = vsyncpa [#allocation4], 0 }
   0x3   :  { %22 = vsyncpa [#allocation4 + $0x1], 0 }
   0x4   :  { %23 = vsyncpa [#allocation7], 0 }
   0x5   :  { %25 = vsyncpa [#allocation7 + $0x1], 0  ;;  %s3487_s17 = smov 0   ;;  %s3489_s18 = smov 0  }
   0x6   :  { %s3491_s19 = smov 0   ;;  %s3493_s20 = smov 0  }
   0x7 LB: > { %4433 = sst [smem:[#allocation11_spill]] %s3411_s19  ;;  %s3508_s21 = sadd.s32 4294967295, %s3415_s20   ;;  %s3415_s20 = sphi %s3493_s20, %s4457_s20   ;;  %s3411_s19 = sphi %s3491_s19, %s4454_s19   ;;  %s3407_s18 = sphi %s3489_s18, %s4456_s18   ;;  %s3403_s17 = sphi %s3487_s17, %s4455_s17  }
   0x8   : > { %s2421_s22 = sadd.s32 4294967294, %s3415_s20   ;;  %s3512_s23 = sadd.s32 1, %s3415_s20  }
   0x9   : > { %s64_s24 = sadd.s32 1, %s3411_s19  ;;  %s61_s25 = ssub.s32 %s3415_s20, %s3512_s23 }
   0xa   : > { %p71_p0 = scmp.ne.s32.totalorder %s3411_s19, %s3407_s18  ;;  %p62_p1 = scmp.eq.s32.totalorder %s61_s25, 0 }
   0xb   : > { %p72_p2 = scmp.eq.s32.totalorder %s3415_s20, 0  ;;  %p77_p3 = scmp.ne.s32.totalorder %s3407_s18, %s3403_s17 }
   0xc   : > { %p78_p4 = scmp.eq.s32.totalorder %s3508_s21, 0  ;;  %p269_p7 = scmp.eq.s32.totalorder %s3508_s21, 1 }
   0xd   : > { %s3524_s26 = scalar_select %p62_p1, %s3411_s19, %s64_s24  }
   0xe   : > { %p3526_p5 = por %p72_p2, %p71_p0  ;;  %p3530_p6 = por %p78_p4, %p77_p3 }
   0xf   : > { %4434 = sst [smem:[#allocation12_spill]] %s3524_s26  ;;  %p275_p8 = scmp.eq.s32.totalorder %s2421_s22, 1 }
  0x10   : > { %p3121_p10 = scmp.lt.s32.totalorder %s3415_s20, 2  ;;  %p3537_p11 = por %p269_p7, %p71_p0 }
  0x11   : > { %p3541_p12 = por %p275_p8, %p77_p3  ;;  %s354_s12 = sand.u32 1, %s3411_s19  }
  0x12   : > { %s4437_s29 = scalar_select %p3537_p11, 1, 0 }
  0x13   : > { %s4438_s30 = scalar_select %p3541_p12, 1, 0 }
  0x14   : > { %s2808_s13 = sshll.u32 %s3415_s20, 12  ;;  %s2424_s14 = sshll.u32 %s354_s12, 8 }
  0x15   : > { %s3550_s24 = scalar_lea.hbm %s4419_s1, %s2808_s13  ;;  %s358_s22 = scalar_lea.vmem [#allocation2], %s2424_s14 }
  0x16   : > { %s366_s25 = sshll.u32 %s358_s22, 4  ;;  %p3554_p13 = pnand %p3121_p10, %p3526_p5  ;;  %s3558_s25 = int_to_ptr.vmem [resolvable:$true] %s366_s25 }
  0x17   : > { %s3560_s19 = scalar_lea.sflag [#allocation3], %s354_s12  ;;  %s3287_s15 = scalar_lea.hbm %s3550_s24, 4096 }
  0x18   : > { %p3288_p0 = scmp.ne.s32.totalorder %s3550_s24, %s3287_s15  ;;  %p3289_p1 = pneg %p3554_p13 }
  0x19   : > { %s3292_s14 = scalar_lea.hbm %s4419_s1, 8192  ;;  %p3293_p4 = scmp.lt.u32.totalorder %s3550_s24, %s4419_s1 }
  0x1a   : > { %p3290_p2 = pnand %p3289_p1, %p3288_p0  ;;  %p3294_p5 = scmp.lt.u32.totalorder %s3292_s14, %s3287_s15 }
  0x1b   : > { %p3296_p8 = scmp.lt.u32.totalorder %s3287_s15, %s3550_s24 }
  0x1c   : > { %p3291_p3 = pneg %p3290_p2  ;;  %p3295_p7 = por %p3294_p5, %p3293_p4 }
  0x1e   : > { %p3297_p10 = por %p3296_p8, %p3295_p7 }
  0x20   : > { %p3298_p9 = pnand %p3297_p10, %p3291_p3 }
  0x22   : > { %3301 = shalt.err (!%p3298_p9)
}
  0x23   : > { %s3302_s12 = scalar_lea.vmem %s3558_s25, 4096  ;;  %s3417_s13 = smov [#allocation2]  }
  0x24   : > { %p3303_p0 = scmp.ne.s32.totalorder %s3558_s25, %s3302_s12  ;;  %s3307_s27 = sshll.u32 %s3417_s13, 4  ;;  %s3308_s27 = int_to_ptr.vmem [resolvable:$false] %s3307_s27 }
  0x25   : > { %s3309_s16 = scalar_lea.vmem %s3308_s27, 8192  ;;  %p3310_p11 = scmp.lt.s32.totalorder %s3558_s25, %s3308_s27 }
  0x26   : > { %p3305_p2 = pnand %p3303_p0, %p3289_p1  ;;  %p3311_p4 = scmp.lt.s32.totalorder %s3309_s16, %s3302_s12 }
  0x28   : > { %p3306_p12 = pneg %p3305_p2  ;;  %p3312_p5 = por %p3311_p4, %p3310_p11 }
  0x2a   : > { %p3313_p7 = pnand %p3312_p5, %p3306_p12 }
  0x2c   : > { %3316 = shalt.err (!%p3313_p7)
}
  0x2d   : > { %s3418_s15 = smov 256   ;;  %s3419_s14 = smov 16  }
  0x2e   : > { %3113 = dma.hbm_to_vmem [thread:$0]  (!%p3554_p13), %s3550_s24, 4096, %s3558_s25, %s3560_s19, %s3418_s15, %s3418_s15, %s3419_s14  }
  0x2f   : > { %p2428_p9 = scmp.ge.s32.totalorder %s3415_s20, 1  ;;  %p374_p1 = scmp.lt.s32.totalorder %s3415_s20, 3 }
  0x31   : > { %p375_p3 = pnand %p2428_p9, %p374_p1 }
  0x32   : > { %s3591_s22 = sand.u32 (!%p375_p3), 1, %s3407_s18  }
  0x33   : > { %378 = sbr.rel (%p375_p3) target bundleno = 948 (0x3b4), region = 60  ;;  %s4432_s12 = sshll.u32 (!%p375_p3), %s3591_s22, 8 }
  0x34   : > { %s381_s13 = scalar_lea.sflag (!%p375_p3), [#allocation3], %s3591_s22  ;;  %s3597_s27 = scalar_lea.vmem (!%p375_p3), [#allocation2], %s4432_s12 }
  0x3a   : > { %3390 = dma.done.wait (%p3530_p6), %s381_s13, 4096  }
  0x3b   : > { %3392 = vsyncadd (%p3530_p6), %s381_s13, 4294963200  ;;  %v3162_v0 = vld [vmem:[%s4420_s2 + $0x100] sm:$0xff]   ;;  %v3166_v4 = vld [vmem:[%s4420_s2 + $0x108] sm:$0xff]   ;;  %s2432_s19 = sshll.u32 %s3508_s21, 2  ;;  %v506_v21 = vlaneseq  ;;  %s2430_s24 = sshll.u32 %s3591_s22, 5 }
  0x3c   : > { %v3163_v1 = vld [vmem:[%s4420_s2 + $0x40] sm:$0xff]   ;;  %2812 = vmatprep.subr.bf16.mxu1 %v3162_v0  ;;  %v3167_v5 = vld [vmem:[%s4420_s2 + $0x48] sm:$0xff]   ;;  %v3170_v8 = vld [vmem:[%s4420_s2 + $0x110] sm:$0xff]   ;;  %p434_p6 = scmp.lt.s32.totalorder %s2432_s19, 7  ;;  %s425_s25 = scalar_lea.vmem [#allocation5], %s2430_s24 }
  0x3d   : > { %v3164_v2 = vld [vmem:[%s4420_s2 + $0xc0] sm:$0xff]   ;;  %2850 = vmatprep.subr.bf16.mxu0 %v3163_v1  ;;  %v3168_v6 = vld [vmem:[%s4420_s2 + $0xc8] sm:$0xff]   ;;  %v3171_v9 = vld [vmem:[%s4420_s2 + $0x50] sm:$0xff]   ;;  %v3679_v26 = vshrl.u32 %v506_v21, 7  ;;  %s2809_s16 = sshll.u32 %s3508_s21, 9  ;;  %p4448_p12 = scmp.ne.s32.totalorder %s4437_s29, 0 }
  0x3e   : > { %v3165_v3 = vld [vmem:[%s4420_s2] sm:$0xff]   ;;  %2813 = vmatpush3.bf16.msra.mxu1 %v3164_v2  ;;  %v3169_v7 = vld [vmem:[%s4420_s2 + $0x8] sm:$0xff]   ;;  %v3172_v10 = vld [vmem:[%s4420_s2 + $0xd0] sm:$0xff]   ;;  %s4459_s19 = smov (!%p434_p6, %s2432_s19), 7  ;;  %s4256_s14 = scalar_lea.hbm %s4428_s10, %s2809_s16 }
  0x3f   : > { %2851 = vmatpush3.bf16.msra.mxu0 %v3165_v3  ;;  %2814 = vmatprep.subr.bf16.mxu1 %v3166_v4  ;;  %v3173_v11 = vld [vmem:[%s4420_s2 + $0x10] sm:$0xff]   ;;  %v3174_v12 = vld [vmem:[%s4420_s2 + $0x118] sm:$0xff]   ;;  %v3178_v16 = vld [vmem:[%s4420_s2 + $0x120] sm:$0xff]   ;;  %v3694_v31 = vadd.s32 8, %v3679_v26  ;;  %s2433_s15 = sshll.u32 %s4459_s19, 3  ;;  %v515_v35 = vand.u32 7, %v3679_v26 }
  0x40   : > { %2852 = vmatprep.subr.bf16.mxu0 %v3167_v5  ;;  %v3175_v13 = vld [vmem:[%s4420_s2 + $0x58] sm:$0xff]   ;;  %v3179_v17 = vld [vmem:[%s4420_s2 + $0x60] sm:$0xff]   ;;  %v3182_v20 = vld [vmem:[%s4420_s2 + $0x128] sm:$0xff]   ;;  %s3716_s13 = scalar_lea.vmem %s4418_s0, %s2433_s15  ;;  %vm571_vm0 = vcmp.lt.s32.totalorder %v3679_v26, 1  ;;  %v3748_v1 = vadd.s32 16, %v3679_v26  ;;  %vm1225_vm10 = vcmp.lt.s32.totalorder %v3679_v26, 7 }
  0x41   : > { %v3176_v14 = vld [vmem:[%s4420_s2 + $0xd8] sm:$0xff]   ;;  %v3180_v18 = vld [vmem:[%s4420_s2 + $0xe0] sm:$0xff]   ;;  %v3183_v22 = vld [vmem:[%s4420_s2 + $0x68] sm:$0xff]   ;;  %v522_v39 = vand.u32 7, %v3694_v31  ;;  %v584_v51 = vadd.s32 4294967295, %v515_v35  ;;  %s3421_s26 = smov [#allocation5]  }
  0x42   : > { %2815 = vmatpush3.bf16.msra.mxu1 %v3168_v6  ;;  %v3177_v15 = vld [vmem:[%s4420_s2 + $0x18] sm:$0xff]   ;;  %v3181_v19 = vld [vmem:[%s4420_s2 + $0x20] sm:$0xff]   ;;  %v3184_v23 = vld [vmem:[%s4420_s2 + $0xe8] sm:$0xff]   ;;  %s3321_s24 = sshll.u32 %s3421_s26, 4  ;;  %s3322_s24 = int_to_ptr.vmem [resolvable:$false] %s3321_s24 }
  0x43   : > { %2853 = vmatpush3.bf16.msra.mxu0 %v3169_v7  ;;  %2816 = vmatprep.subr.bf16.mxu1 %v3170_v8  ;;  %v3185_v24 = vld [vmem:[%s4420_s2 + $0x28] sm:$0xff]   ;;  %v3186_v25 = vld [vmem:[%s4420_s2 + $0x130] sm:$0xff]   ;;  %v3190_v30 = vld [vmem:[%s4420_s2 + $0x138] sm:$0xff]   ;;  %v585_v55 = vadd.s32 4294967295, %v522_v39  ;;  %vm588_vm1 = vcmp.ge.s32.totalorder %v584_v51, 0 }
  0x44   : > { %2854 = vmatprep.subr.bf16.mxu0 %v3171_v9  ;;  %v3187_v27 = vld [vmem:[%s4420_s2 + $0x70] sm:$0xff]   ;;  %v3191_v32 = vld [vmem:[%s4420_s2 + $0x78] sm:$0xff]   ;;  %v443_v36 = vld [vmem:[%s3597_s27] sm:$0xff] }
  0x45   : > { %v3188_v28 = vld [vmem:[%s4420_s2 + $0xf0] sm:$0xff]   ;;  %v3192_v33 = vld [vmem:[%s4420_s2 + $0xf8] sm:$0xff]   ;;  %v445_v37 = vld [vmem:[%s3597_s27 + $0x40] sm:$0xff]  ;;  %vm589_vm2 = vcmp.ge.s32.totalorder %v585_v55, 0 }
  0x46   : > { %2817 = vmatpush3.bf16.msra.mxu1 %v3172_v10  ;;  %v3189_v29 = vld [vmem:[%s4420_s2 + $0x30] sm:$0xff]   ;;  %v3193_v34 = vld [vmem:[%s4420_s2 + $0x38] sm:$0xff]   ;;  %v2442_v42 = vld [vmem:[%s3597_s27 + $0x20] sm:$0xff] }
  0x47   : > { %2855 = vmatpush3.bf16.msra.mxu0 %v3173_v11  ;;  %2818 = vmatprep.subr.bf16.mxu1 %v3174_v12  ;;  %v2434_v38 = vld [vmem:[%s3597_s27 + $0x10] sm:$0xff]  ;;  %v2444_v43 = vld [vmem:[%s3597_s27 + $0x60] sm:$0xff]  ;;  %v3732_v57 = vld [vmem:[%s3716_s13 + $0x8] sm:$0xff]  ;;  %v3771_v11 = vadd.s32 24, %v3679_v26 }
  0x48   : > { %2856 = vmatprep.subr.bf16.mxu0 %v3175_v13  ;;  %v2436_v40 = vld [vmem:[%s3597_s27 + $0x50] sm:$0xff]  ;;  %v460_v41 = vmax.f32 %v443_v36, %v2434_v38  ;;  %v449_v46 = vld [vmem:[%s3597_s27 + $0xc0] sm:$0xff]  ;;  %v3737_v59 = vld [vmem:[%s3716_s13 + $0x18] sm:$0xff]  ;;  %v562_v61 = vrot.slane %v3732_v57, 7 }
  0x49   : > { %v462_v44 = vmax.f32 %v445_v37, %v2436_v40  ;;  %v2450_v45 = vld [vmem:[%s3597_s27 + $0x30] sm:$0xff]  ;;  %v2448_v50 = vld [vmem:[%s3597_s27 + $0xe0] sm:$0xff]  ;;  %v568_v4 = vrot.slane %v3737_v59, 7  ;;  %vm3782_vm3 = vmpackc.low %vm589_vm2, %vm588_vm1 }
  0x4a   : > { %2819 = vmatpush3.bf16.msra.mxu1 %v3176_v14  ;;  %v477_v47 = vmax.f32 %v460_v41, %v2442_v42  ;;  %v2452_v48 = vld [vmem:[%s3597_s27 + $0x70] sm:$0xff]  ;;  %v3729_v56 = vld [vmem:[%s3716_s13] sm:$0xff]  ;;  %v3197_v14 = vld [vmem:[%s4420_s2 + $0x148] sm:$0xff]  }
  0x4b   : > { %2857 = vmatpush3.bf16.msra.mxu0 %v3177_v15  ;;  %2820 = vmatprep.subr.bf16.mxu1 %v3178_v16  ;;  %v2440_v49 = vld [vmem:[%s3597_s27 + $0xd0] sm:$0xff]  ;;  %v479_v52 = vmax.f32 %v462_v44, %v2444_v43  ;;  %v559_v60 = vrot.slane %v3729_v56, 7  ;;  %v3194_v62 = vld [vmem:[%s4420_s2 + $0x140] sm:$0xff]   ;;  %v674_v3 = vpack.c.bf16 %v3732_v57, %v3729_v56  ;;  %v529_v16 = vand.u32 7, %v3748_v1  ;;  %v3205_v36 = vld [vmem:[%s4420_s2 + $0x198] sm:$0xff]  }
  0x4c   : > { %2858 = vmatprep.subr.bf16.mxu0 %v3179_v17  ;;  %v466_v53 = vmax.f32 %v449_v46, %v2440_v49  ;;  %v2456_v54 = vld [vmem:[%s3597_s27 + $0xf0] sm:$0xff]  ;;  %v3734_v58 = vmax.f32 %v477_v47, %v2450_v45  ;;  %v3195_v5 = vld [vmem:[%s4420_s2 + $0x1c0] sm:$0xff]   ;;  %v3209_v38 = vld [vmem:[%s4420_s2 + $0x168] sm:$0xff]  }
  0x4d   : > { %v3744_v63 = vmax.f32 %v479_v52, %v2452_v48  ;;  %v578_v9 = vsel %vm571_vm0, %v559_v60, %v562_v61  ;;  %v581_v10 = vsel %vm571_vm0, %v568_v4, %v559_v60  ;;  %v3200_v21 = vld [vmem:[%s4420_s2 + $0x150] sm:$0xff]   ;;  %v447_v31 = vld [vmem:[%s3597_s27 + $0x80] sm:$0xff]  ;;  %v3210_v52 = vld [vmem:[%s4420_s2 + $0x1e8] sm:$0xff]  }
  0x4e   : > { %2821 = vmatpush3.bf16.msra.mxu1 %v3180_v18  ;;  %v483_v0 = vmax.f32 %v466_v53, %v2448_v50  ;;  %v560_v2 = vrot.slane %v3734_v58, 7  ;;  %v2558_v18 = vpack.c.bf16 %v578_v9, %v581_v10  ;;  %v2438_v37 = vld [vmem:[%s3597_s27 + $0x90] sm:$0xff]  ;;  %v2446_v40 = vld [vmem:[%s3597_s27 + $0xa0] sm:$0xff]  ;;  %v1214_v47 = vrot.slane %v3734_v58, 1  ;;  %v3215_v10 = vld [vmem:[%s4420_s2 + $0x178] sm:$0xff]  }
  0x4f   : > { %2859 = vmatpush3.bf16.msra.mxu0 %v3181_v19  ;;  %2822 = vmatprep.subr.bf16.mxu1 %v3182_v20  ;;  %v675_v6 = vpack.c.bf16 %v3744_v63, %v3734_v58  ;;  %v563_v8 = vrot.slane %v3744_v63, 7  ;;  %v3196_v19 = vld [vmem:[%s4420_s2 + $0x180] sm:$0xff]   ;;  %v2454_v42 = vld [vmem:[%s3597_s27 + $0xb0] sm:$0xff]  ;;  %v1217_v48 = vrot.slane %v3744_v63, 1  ;;  %v3216_v1 = vld [vmem:[%s4420_s2 + $0x1f8] sm:$0xff]  }
  0x50   : > { %2860 = vmatprep.subr.bf16.mxu0 %v3183_v22  ;;  %v3759_v7 = vmax.f32 %v483_v0, %v2456_v54  ;;  %v536_v22 = vand.u32 7, %v3771_v11  ;;  %v3847_v43 = vld [vmem:[%s3716_s13 + $0x10] sm:$0xff]  ;;  %v3207_v44 = vld [vmem:[%s4420_s2 + $0x1e0] sm:$0xff]   ;;  %v3247_v15 = vld [vmem:[%s4423_s5 + $0x28] sm:$0xff]   ;;  %s2287_s13 = sshll.u32 %s425_s25, 4  ;;  %s4250_s13 = int_to_ptr.vmem [resolvable:$true] %s2287_s13 }
  0x51   : > { %905 = vmatprep.mubr.bf16.mxu1 %v675_v6  ;;  %v579_v13 = vsel %vm571_vm0, %v560_v2, %v563_v8  ;;  %v565_v46 = vrot.slane %v3847_v43, 7  ;;  %v3208_v50 = vld [vmem:[%s4420_s2 + $0x1a0] sm:$0xff]   ;;  %v677_v53 = vpack.c.bf16 %v3737_v59, %v3847_v43  ;;  %v3212_v0 = vld [vmem:[%s4420_s2 + $0x170] sm:$0xff]   ;;  %v3255_v49 = vld [vmem:[%s4423_s5 + $0xa8] sm:$0xff]   ;;  %s3317_s28 = scalar_lea.vmem %s4250_s13, 512  ;;  %p3324_p10 = scmp.lt.s32.totalorder %s4250_s13, %s3322_s24 }
  0x52   : > { %2823 = vmatpush3.bf16.msra.mxu1 %v3184_v23  ;;  %v569_v12 = vrot.slane %v3759_v7, 7  ;;  %v3198_v23 = vld [vmem:[%s4420_s2 + $0x1c8] sm:$0xff]   ;;  %v3213_v9 = vld [vmem:[%s4420_s2 + $0x1f0] sm:$0xff]   ;;  %v3254_v41 = vld [vmem:[%s4423_s5 + $0xa0] sm:$0xff]   ;;  %p3318_p11 = scmp.ne.s32.totalorder %s4250_s13, %s3317_s28 }
  0x53   : > { %2861 = vmatpush3.bf16.msra.mxu0 %v3185_v24  ;;  %2824 = vmatprep.subr.bf16.mxu1 %v3186_v25  ;;  %v586_v24 = vadd.s32 4294967295, %v529_v16  ;;  %v3199_v25 = vld [vmem:[%s4420_s2 + $0x188] sm:$0xff]   ;;  %v572_v54 = vsel %vm571_vm0, %v565_v46, %v568_v4  ;;  %v575_v55 = vsel %vm571_vm0, %v562_v61, %v565_v46  ;;  %v1233_v61 = vsel %vm1225_vm10, %v1214_v47, %v1217_v48  ;;  %v2457_v46 = vld [vmem:[%s3597_s27 + $0xf8] sm:$0xff] }
  0x54   : > { %2862 = vmatprep.subr.bf16.mxu0 %v3187_v27  ;;  %v582_v17 = vsel %vm571_vm0, %v569_v12, %v560_v2  ;;  %v3203_v27 = vld [vmem:[%s4420_s2 + $0x158] sm:$0xff]   ;;  %v3211_v2 = vld [vmem:[%s4420_s2 + $0x1a8] sm:$0xff]   ;;  %v2564_v6 = vpack.c.bf16 %v572_v54, %v575_v55  ;;  %p3319_p13 = pnand %p3318_p11, %p4448_p12 }
  0x55   : > { %v2555_v20 = vpack.c.bf16 %v579_v13, %v582_v17  ;;  %vm590_vm4 = vcmp.ge.s32.totalorder %v586_v24, 0  ;;  %v3907_v13 = vld [vmem:[%s3597_s27 + $0x8] sm:$0xff]  ;;  %v2437_v17 = vld [vmem:[%s3597_s27 + $0x58] sm:$0xff] }
  0x56   : > { %2825 = vmatpush3.bf16.msra.mxu1 %v3188_v28  ;;  %v587_v28 = vadd.s32 4294967295, %v536_v22  ;;  %v3927_v24 = vld [vmem:[%s3597_s27 + $0x38] sm:$0xff]  ;;  %p3320_p8 = pneg %p3319_p13 }
  0x57   : > { %2863 = vmatpush3.bf16.msra.mxu0 %v3189_v29  ;;  %2826 = vmatprep.subr.bf16.mxu1 %v3190_v30  ;;  %v3201_v29 = vld [vmem:[%s4420_s2 + $0x1d0] sm:$0xff]   ;;  %v1238_v30 = vadd.s32 1, %v515_v35  ;;  %v3204_v35 = vld [vmem:[%s4420_s2 + $0x1d8] sm:$0xff]  }
  0x58   : > { %2864 = vmatprep.subr.bf16.mxu0 %v3191_v32  ;;  %2556 = vmatprep.mubr.msk.bf16.mxu0 %vm3782_vm3, %v2555_v20  ;;  %v3202_v32 = vld [vmem:[%s4420_s2 + $0x190] sm:$0xff]   ;;  %vm591_vm5 = vcmp.ge.s32.totalorder %v587_v28, 0  ;;  %v3218_v28 = vld [vmem:[%s4420_s2 + $0x80] sm:$0xff]  }
  0x59   : > { %vm3841_vm6 = vmpackc.low %vm591_vm5, %vm590_vm4  ;;  %vm1246_vm7 = vcmp.lt.s32.totalorder %v1238_v30, 8 }
  0x5a   : > { %2827 = vmatpush3.bf16.msra.mxu1 %v3192_v33  ;;  %v1239_v33 = vadd.s32 1, %v522_v39  ;;  %v464_v39 = vmax.f32 %v447_v31, %v2438_v37  ;;  %v1216_v31 = vrot.slane %v3732_v57, 1  ;;  %v1219_v37 = vrot.slane %v3847_v43, 1  ;;  %v3967_v43 = vld [vmem:[%s3597_s27 + $0xb8] sm:$0xff] }
  0x5b   : > { %2865 = vmatpush3.bf16.msra.mxu0 %v3193_v34  ;;  %2956 = vmatprep.subr.bf16.mxu1 %v3194_v62  ;;  %v3206_v34 = vld [vmem:[%s4420_s2 + $0x160] sm:$0xff]  }
  0x5c   : > { %2888 = vmatprep.subr.bf16.mxu0 %v3195_v5  ;;  %vm1247_vm8 = vcmp.lt.s32.totalorder %v1239_v33, 8  ;;  %v481_v45 = vmax.f32 %v464_v39, %v2446_v40  ;;  %v450_v33 = vld [vmem:[%s3597_s27 + $0xc8] sm:$0xff]  ;;  %v1229_v55 = vsel %vm1225_vm10, %v1216_v31, %v1219_v37 }
  0x5d   : > { %906 = vmatmul.mubr.bf16.vlgmr.msra.gmra.mrb[0].mxu1 %v674_v3  ;;  %vm3855_vm9 = vmpackc.low %vm1247_vm8, %vm1246_vm7  ;;  %v2447_v40 = vld [vmem:[%s3597_s27 + $0xa8] sm:$0xff] }
  0x5e   : > { %2957 = vmatpush3.bf16.msra.mxu1 %v3194_v62  ;;  %2559 = vmatmul.mubr.msk.bf16.vlgmr.msra.gmra.mrb[0].mxu0 %vm3782_vm3, %v2558_v18  ;;  %v3863_v51 = vmax.f32 %v481_v45, %v2454_v42  ;;  %v3919_v18 = vld [vmem:[%s3597_s27 + $0x28] sm:$0xff] }
  0x5f   : > { %2958 = vmatprep.subr.bf16.mxu1 %v3197_v14  ;;  %2889 = vmatpush3.bf16.msra.mxu0 %v3196_v19  ;;  %v2449_v42 = vld [vmem:[%s3597_s27 + $0xe8] sm:$0xff] }
  0x60   : > { %2890 = vmatprep.subr.bf16.mxu0 %v3198_v23  ;;  %v678_v60 = vpack.c.bf16 %v3759_v7, %v3863_v51  ;;  %v566_v62 = vrot.slane %v3863_v51, 7  ;;  %v1220_v3 = vrot.slane %v3863_v51, 1  ;;  %v3924_v23 = vld [vmem:[%s3597_s27 + $0x68] sm:$0xff] }
  0x62   : > { %2959 = vmatpush3.bf16.msra.mxu1 %v3197_v14  ;;  %913 = vmatprep.mubr.bf16.mxu1 %v678_v60  ;;  %v573_v4 = vsel %vm571_vm0, %v566_v62, %v569_v12  ;;  %v576_v5 = vsel %vm571_vm0, %v563_v8, %v566_v62  ;;  %v446_v12 = vld [vmem:[%s3597_s27 + $0x48] sm:$0xff]  ;;  %v1230_v8 = vsel %vm1225_vm10, %v1217_v48, %v1220_v3  ;;  %v3915_v14 = vld [vmem:[%s3597_s27 + $0x18] sm:$0xff]  ;;  %v1241_v48 = vadd.s32 1, %v536_v22 }
  0x63   : > { %2960 = vmatprep.subr.bf16.mxu1 %v3200_v21  ;;  %2891 = vmatpush3.bf16.msra.mxu0 %v3199_v25  ;;  %v2561_v63 = vpack.c.bf16 %v573_v4, %v576_v5  ;;  %v2645_v19 = vpack.c.bf16 %v1230_v8, %v1233_v61  ;;  %v461_v20 = vmax.f32 %v3907_v13, %v3915_v14  ;;  %v3930_v25 = vld [vmem:[%s3597_s27 + $0x78] sm:$0xff]  ;;  %v3219_v4 = vld [vmem:[%s4420_s2 + $0x88] sm:$0xff]   ;;  %v1222_v5 = vrot.slane %v3737_v59, 1 }
  0x64   : > { %2892 = vmatprep.subr.bf16.mxu0 %v3201_v29  ;;  %vm1249_vm12 = vcmp.lt.s32.totalorder %v1241_v48, 8  ;;  %v3234_v48 = vld [vmem:[%s4423_s5 + $0x40] sm:$0xff]  }
  0x65   : > { %914 = vmatmul.mubr.bf16.gmra.mrb[4].mxu1 %v677_v53  ;;  %2562 = vmatprep.mubr.msk.bf16.mxu0 %vm3841_vm6, %v2561_v63  ;;  %v478_v29 = vmax.f32 %v461_v20, %v3919_v18  ;;  %v1226_v59 = vsel %vm1225_vm10, %v1219_v37, %v1222_v5  ;;  %v3221_v63 = vld [vmem:[%s4420_s2 + $0x98] sm:$0xff]  }
  0x66   : > { %2961 = vmatpush3.bf16.msra.mxu1 %v3200_v21  ;;  %v463_v21 = vmax.f32 %v446_v12, %v2437_v17  ;;  %2565 = vmatmul.mubr.msk.bf16.gmra.mrb[4].mxu0 %vm3841_vm6, %v2564_v6 }
  0x67   : > { %2962 = vmatprep.subr.bf16.mxu1 %v3203_v27  ;;  %2893 = vmatpush3.bf16.msra.mxu0 %v3202_v32  ;;  %v448_v32 = vld [vmem:[%s3597_s27 + $0x88] sm:$0xff] }
  0x68   : > { %2894 = vmatprep.subr.bf16.mxu0 %v3204_v35  ;;  %v480_v30 = vmax.f32 %v463_v21, %v3924_v23  ;;  %v1240_v35 = vadd.s32 1, %v529_v16  ;;  %2646 = vmatprep.mubr.msk.bf16.mxu0 %vm3855_vm9, %v2645_v19 }
  0x6a   : > { %2963 = vmatpush3.bf16.msra.mxu1 %v3203_v27  ;;  %v3214_v27 = vld [vmem:[%s4420_s2 + $0x1b0] sm:$0xff]   ;;  %v3964_v57 = vmax.f32 %v480_v30, %v3930_v25  ;;  %vm1248_vm11 = vcmp.lt.s32.totalorder %v1240_v35, 8  ;;  %v3225_v30 = vld [vmem:[%s4420_s2 + $0xb8] sm:$0xff]  }
  0x6b   : > { %2964 = vmatprep.subr.bf16.mxu1 %v3206_v34  ;;  %2895 = vmatpush3.bf16.msra.mxu0 %v3205_v36  ;;  %v1213_v36 = vrot.slane %v3729_v56, 1  ;;  %v3961_v56 = vmax.f32 %v478_v29, %v3927_v24  ;;  %vm4006_vm13 = vmpackc.low %vm1249_vm12, %vm1248_vm11  ;;  %v3224_v29 = vld [vmem:[%s4420_s2 + $0xb0] sm:$0xff]  }
  0x6c   : > { %2896 = vmatprep.subr.bf16.mxu0 %v3207_v44  ;;  %v1223_v44 = vrot.slane %v3759_v7, 1  ;;  %v3217_v7 = vld [vmem:[%s4420_s2 + $0x1b8] sm:$0xff]   ;;  %v564_v22 = vrot.slane %v3964_v57, 7  ;;  %v1218_v20 = vrot.slane %v3964_v57, 1 }
  0x6d   : > { %v561_v53 = vrot.slane %v3961_v56, 7  ;;  %v1232_v54 = vsel %vm1225_vm10, %v1213_v36, %v1216_v31  ;;  %v1235_v12 = vsel %vm1225_vm10, %v1222_v5, %v1213_v36  ;;  %v1215_v19 = vrot.slane %v3961_v56, 1 }
  0x6e   : > { %2965 = vmatpush3.bf16.msra.mxu1 %v3206_v34  ;;  %v2439_v34 = vld [vmem:[%s3597_s27 + $0x98] sm:$0xff]  ;;  %v1227_v62 = vsel %vm1225_vm10, %v1220_v3, %v1223_v44  ;;  %v2654_v8 = vpack.c.bf16 %v1235_v12, %v1226_v59 }
  0x6f   : > { %2966 = vmatprep.subr.bf16.mxu1 %v3209_v38  ;;  %2897 = vmatpush3.bf16.msra.mxu0 %v3208_v50  ;;  %v465_v39 = vmax.f32 %v448_v32, %v2439_v34  ;;  %v676_v50 = vpack.c.bf16 %v3964_v57, %v3961_v56  ;;  %v580_v3 = vsel %vm571_vm0, %v561_v53, %v564_v22  ;;  %v3226_v32 = vld [vmem:[%s4420_s2 + $0x200] sm:$0xff]   ;;  %v3232_v56 = vld [vmem:[%s4420_s2 + $0x230] sm:$0xff]  }
  0x70   : > { %2898 = vmatprep.subr.bf16.mxu0 %v3210_v52  ;;  %v1234_v36 = vsel %vm1225_vm10, %v1215_v19, %v1218_v20 }
  0x71   : > { %v482_v45 = vmax.f32 %v465_v39, %v2447_v40  ;;  %2972 = vmatprep.mubr.bf16.mxu1 %v676_v50  ;;  %v3228_v39 = vld [vmem:[%s4420_s2 + $0x210] sm:$0xff]   ;;  %v3229_v40 = vld [vmem:[%s4420_s2 + $0x218] sm:$0xff]   ;;  %v3235_v50 = vld [vmem:[%s4423_s5 + $0x48] sm:$0xff]  }
  0x72   : > { %2967 = vmatpush3.bf16.msra.mxu1 %v3209_v38  ;;  %v2441_v38 = vld [vmem:[%s3597_s27 + $0xd8] sm:$0xff] }
  0x73   : > { %2968 = vmatprep.subr.bf16.mxu1 %v3212_v0  ;;  %2899 = vmatpush3.bf16.msra.mxu0 %v3211_v2  ;;  %v467_v16 = vmax.f32 %v450_v33, %v2441_v38  ;;  %v3984_v11 = vmax.f32 %v482_v45, %v3967_v43  ;;  %v2648_v2 = vpack.c.bf16 %v1229_v55, %v1232_v54  ;;  %v3227_v38 = vld [vmem:[%s4420_s2 + $0x208] sm:$0xff]   ;;  %v3238_v54 = vld [vmem:[%s4423_s5 + $0x60] sm:$0xff]  }
  0x74   : > { %2900 = vmatprep.subr.bf16.mxu0 %v3213_v9  ;;  %v3239_v55 = vld [vmem:[%s4423_s5 + $0x68] sm:$0xff]  }
  0x75   : > { %v484_v52 = vmax.f32 %v467_v16, %v2449_v42  ;;  %v567_v17 = vrot.slane %v3984_v11, 7  ;;  %v1221_v21 = vrot.slane %v3984_v11, 1  ;;  %v3230_v42 = vld [vmem:[%s4420_s2 + $0x220] sm:$0xff]   ;;  %v3233_v16 = vld [vmem:[%s4420_s2 + $0x238] sm:$0xff]  }
  0x76   : > { %2969 = vmatpush3.bf16.msra.mxu1 %v3212_v0  ;;  %v1236_v0 = vsel %vm1225_vm10, %v1223_v44, %v1214_v47  ;;  %v3276_v47 = vld [vmem:[%s4426_s8 + $0x60] ss:$8 sps:$4 sm:$0xff]  }
  0x77   : > { %2970 = vmatprep.subr.bf16.mxu1 %v3215_v10  ;;  %2901 = vmatpush3.bf16.msra.mxu0 %v3214_v27  ;;  %v3987_v60 = vmax.f32 %v484_v52, %v2457_v46  ;;  %v2651_v58 = vpack.c.bf16 %v1236_v0, %v1227_v62  ;;  %v3222_v27 = vld [vmem:[%s4420_s2 + $0xa0] sm:$0xff]   ;;  %v577_v34 = vsel %vm571_vm0, %v564_v22, %v567_v17  ;;  %v3236_v52 = vld [vmem:[%s4423_s5 + $0x50] sm:$0xff]  }
  0x78   : > { %2902 = vmatprep.subr.bf16.mxu0 %v3216_v1  ;;  %v1231_v35 = vsel %vm1225_vm10, %v1218_v20, %v1221_v21  ;;  %v3231_v1 = vld [vmem:[%s4420_s2 + $0x228] sm:$0xff]   ;;  %v4116_v22 = vld [vmem:[%s4423_s5] sm:$0xff]  }
  0x79   : > { %v679_v61 = vpack.c.bf16 %v3987_v60, %v3984_v11  ;;  %v570_v51 = vrot.slane %v3987_v60, 7  ;;  %v2657_v37 = vpack.c.bf16 %v1231_v35, %v1234_v36  ;;  %v1224_v57 = vrot.slane %v3987_v60, 1  ;;  %v3241_v11 = vld [vmem:[%s4423_s5 + $0x78] sm:$0xff]  }
  0x7a   : > { %2971 = vmatpush3.bf16.msra.mxu1 %v3215_v10  ;;  %v3220_v10 = vld [vmem:[%s4420_s2 + $0x90] sm:$0xff]  }
  0x7b   : > { %2976 = vmatprep.subr.bf16.mxu1 %v3218_v28  ;;  %2903 = vmatpush3.bf16.msra.mxu0 %v3217_v7  ;;  %v583_v6 = vsel %vm571_vm0, %v570_v51, %v561_v53  ;;  %v574_v33 = vsel %vm571_vm0, %v567_v17, %v570_v51  ;;  %v1228_v44 = vsel %vm1225_vm10, %v1221_v21, %v1224_v57  ;;  %v3237_v53 = vld [vmem:[%s4423_s5 + $0x58] sm:$0xff]   ;;  %v3240_v7 = vld [vmem:[%s4423_s5 + $0x70] sm:$0xff]  }
  0x7c   : > { %v2567_v9 = vpack.c.bf16 %v580_v3, %v583_v6  ;;  %v2570_v31 = vpack.c.bf16 %v574_v33, %v577_v34  ;;  %v1237_v45 = vsel %vm1225_vm10, %v1224_v57, %v1215_v19  ;;  %3016 = vmatprep.subr.bf16.mxu0 %v3234_v48 }
  0x7d   : > { %2973 = vmatmul.mubr.bf16.vlgmr.msra.gmra.mrb[8].mxu1 %v679_v61  ;;  %v2660_v46 = vpack.c.bf16 %v1237_v45, %v1228_v44 }
  0x7e   : > { %2977 = vmatpush3.bf16.msra.mxu1 %v3218_v28  ;;  %2649 = vmatmul.mubr.msk.bf16.vlgmr.msra.gmra.mrb[8].mxu0 %vm3855_vm9, %v2648_v2  ;;  %v3223_v28 = vld [vmem:[%s4420_s2 + $0xa8] sm:$0xff]  }
  0x7f   : > { %2978 = vmatprep.subr.bf16.mxu1 %v3219_v4  ;;  %2652 = vmatprep.mubr.msk.bf16.mxu0 %vm4006_vm13, %v2651_v58 }
  0x80   : > { %2992 = vmatprep.mubr.msk.bf16.mxu1 %vm3782_vm3, %v2567_v9  ;;  %3017 = vmatpush3.bf16.msra.mxu0 %v3234_v48  ;;  %v3258_v48 = vld [vmem:[%s4426_s8] ss:$8 sps:$4 sm:$0xff]  }
  0x81   : > { %3018 = vmatprep.subr.bf16.mxu0 %v3235_v50 }
  0x82   : > { %2979 = vmatpush3.bf16.msra.mxu1 %v3219_v4 }
  0x83   : > { %2980 = vmatprep.subr.bf16.mxu1 %v3220_v10 }
  0x84   : > { %3019 = vmatpush3.bf16.msra.mxu0 %v3235_v50  ;;  %v3260_v50 = vld [vmem:[%s4426_s8 + $0x4] ss:$8 sps:$4 sm:$0xff]  }
  0x85   : > { %3020 = vmatprep.subr.bf16.mxu0 %v3236_v52 }
  0x86   : > { %2981 = vmatpush3.bf16.msra.mxu1 %v3220_v10  ;;  %2655 = vmatmul.mubr.msk.bf16.gmra.mrb[12].mxu0 %vm4006_vm13, %v2654_v8 }
  0x87   : > { %2982 = vmatprep.subr.bf16.mxu1 %v3221_v63 }
  0x88   : > { %3021 = vmatpush3.bf16.msra.mxu0 %v3236_v52 }
  0x89   : > { %3022 = vmatprep.subr.bf16.mxu0 %v3237_v53 }
  0x8a   : > { %2983 = vmatpush3.bf16.msra.mxu1 %v3221_v63 }
  0x8b   : > { %2984 = vmatprep.subr.bf16.mxu1 %v3222_v27 }
  0x8c   : > { %3023 = vmatpush3.bf16.msra.mxu0 %v3237_v53  ;;  %v3263_v53 = vld [vmem:[%s4426_s8 + $0x14] ss:$8 sps:$4 sm:$0xff]  }
  0x8d   : > { %3024 = vmatprep.subr.bf16.mxu0 %v3238_v54 }
  0x8e   : > { %2985 = vmatpush3.bf16.msra.mxu1 %v3222_v27 }
  0x8f   : > { %2986 = vmatprep.subr.bf16.mxu1 %v3223_v28 }
  0x90   : > { %3025 = vmatpush3.bf16.msra.mxu0 %v3238_v54  ;;  %v3261_v54 = vld [vmem:[%s4426_s8 + $0x10] ss:$8 sps:$4 sm:$0xff]  }
  0x91   : > { %3026 = vmatprep.subr.bf16.mxu0 %v3239_v55 }
  0x92   : > { %2987 = vmatpush3.bf16.msra.mxu1 %v3223_v28 }
  0x93   : > { %2988 = vmatprep.subr.bf16.mxu1 %v3224_v29 }
  0x94   : > { %3027 = vmatpush3.bf16.msra.mxu0 %v3239_v55  ;;  %v3266_v55 = vld [vmem:[%s4426_s8 + $0x24] ss:$8 sps:$4 sm:$0xff]  }
  0x95   : > { %3028 = vmatprep.subr.bf16.mxu0 %v3240_v7 }
  0x96   : > { %2989 = vmatpush3.bf16.msra.mxu1 %v3224_v29 }
  0x97   : > { %2990 = vmatprep.subr.bf16.mxu1 %v3225_v30 }
  0x98   : > { %3029 = vmatpush3.bf16.msra.mxu0 %v3240_v7  ;;  %v3264_v7 = vld [vmem:[%s4426_s8 + $0x20] ss:$8 sps:$4 sm:$0xff]  }
  0x99   : > { %3030 = vmatprep.subr.bf16.mxu0 %v3241_v11 }
  0x9a   : > { %2991 = vmatpush3.bf16.msra.mxu1 %v3225_v30 }
  0x9b   : > { %2996 = vmatprep.subr.bf16.mxu1 %v3226_v32 }
  0x9c   : > { %3031 = vmatpush3.bf16.msra.mxu0 %v3241_v11  ;;  %v3269_v11 = vld [vmem:[%s4426_s8 + $0x34] ss:$8 sps:$4 sm:$0xff]  }
  0x9d   : > { %2993 = vmatmul.mubr.msk.bf16.vlgmr.msra.gmra.mrb[8].mxu1 %vm3841_vm6, %v2570_v31  ;;  %3036 = vmatprep.subr.bf16.mxu0 %v4116_v22 }
  0x9e   : > { %2997 = vmatpush3.bf16.msra.mxu1 %v3226_v32  ;;  %3012 = vmatprep.mubr.msk.bf16.mxu1 %vm3855_vm9, %v2657_v37 }
  0x9f   : > { %2998 = vmatprep.subr.bf16.mxu1 %v3227_v38 }
  0xa2   : > { %2999 = vmatpush3.bf16.msra.mxu1 %v3227_v38 }
  0xa3   : > { %3000 = vmatprep.subr.bf16.mxu1 %v3228_v39 }
  0xa6   : > { %3001 = vmatpush3.bf16.msra.mxu1 %v3228_v39 }
  0xa7   : > { %3002 = vmatprep.subr.bf16.mxu1 %v3229_v40 }
  0xaa   : > { %3003 = vmatpush3.bf16.msra.mxu1 %v3229_v40 }
  0xab   : > { %3004 = vmatprep.subr.bf16.mxu1 %v3230_v42 }
  0xae   : > { %3005 = vmatpush3.bf16.msra.mxu1 %v3230_v42 }
  0xaf   : > { %3006 = vmatprep.subr.bf16.mxu1 %v3231_v1 }
  0xb2   : > { %3007 = vmatpush3.bf16.msra.mxu1 %v3231_v1 }
  0xb3   : > { %3008 = vmatprep.subr.bf16.mxu1 %v3232_v56 }
  0xb6   : > { %3009 = vmatpush3.bf16.msra.mxu1 %v3232_v56 }
  0xb7   : > { %3010 = vmatprep.subr.bf16.mxu1 %v3233_v16 }
  0xba   : > { %3011 = vmatpush3.bf16.msra.mxu1 %v3233_v16 }
  0xbb   : > { %2116 = vmatprep.subr.bf16.mxu1 %v3260_v50 }
  0xbd   : > { %3013 = vmatmul.mubr.msk.bf16.vlgmr.msra.gmra.mrb[8].mxu1 %vm4006_vm13, %v2660_v46 }
  0xbe   : > { %2117 = vmatpush1.bf16.msra.mxu1 %v3258_v48 }
  0xbf   : > { %2118 = vmatprep.subr.bf16.mxu1 %v3263_v53 }
  0xc2   : > { %2119 = vmatpush1.bf16.msra.mxu1 %v3261_v54 }
  0xc3   : > { %2120 = vmatprep.subr.bf16.mxu1 %v3266_v55  ;;  %v3244_v55 = vld [vmem:[%s4423_s5 + $0x10] sm:$0xff]  }
  0xc6   : > { %2121 = vmatpush1.bf16.msra.mxu1 %v3264_v7  ;;  %v3245_v7 = vld [vmem:[%s4423_s5 + $0x18] sm:$0xff]  }
  0xc7   : > { %2122 = vmatprep.subr.bf16.mxu1 %v3269_v11  ;;  %v3248_v11 = vld [vmem:[%s4423_s5 + $0x30] sm:$0xff]  }
 0x130   : > { %v2828_v60 = vpop.f32.mrb[0].mxu1 }
 0x131   : > { %v2829_v62 = vpop.f32.mrb[1].mxu1  ;;  %v2866_v51 = vpop.f32.mrb[0].mxu0 }
 0x132   : > { %v2830_v0 = vadd.f32 %v2829_v62, %v2828_v60  ;;  %v2831_v2 = vpop.f32.mrb[2].mxu1  ;;  %v2867_v3 = vpop.f32.mrb[1].mxu0  ;;  %v3267_v60 = vld [vmem:[%s4426_s8 + $0x30] ss:$8 sps:$4 sm:$0xff]   ;;  %v3272_v62 = vld [vmem:[%s4426_s8 + $0x44] ss:$8 sps:$4 sm:$0xff]  }
 0x133   : > { %v2832_v61 = vpop.f32.mrb[3].mxu1  ;;  %v2868_v58 = vadd.f32 %v2867_v3, %v2866_v51  ;;  %v2869_v5 = vpop.f32.mrb[2].mxu0  ;;  %2123 = vmatpush1.bf16.msra.mxu1 %v3267_v60  ;;  %v2663_v3 = vld [vmem:[%s4422_s4] ss:$0 sm:$0xff]  ;;  %v3249_v60 = vld [vmem:[%s4423_s5 + $0x38] sm:$0xff]  }
 0x134   : > { %v2833_v4 = vadd.f32 %v2832_v61, %v2831_v2  ;;  %v2870_v6 = vpop.f32.mrb[3].mxu0  ;;  %2124 = vmatprep.subr.bf16.mxu1 %v3272_v62  ;;  %v2662_v61 = vld [vmem:[%s4421_s3] ss:$0 sm:$0xff] }
 0x135   : > { %v3079_v9 = vadd.f32 %v2868_v58, %v2830_v0  ;;  %v2871_v10 = vadd.f32 %v2870_v6, %v2869_v5  ;;  %v3270_v0 = vld [vmem:[%s4426_s8 + $0x40] ss:$8 sps:$4 sm:$0xff]  }
 0x136   : > { %v3250_v62 = vld [vmem:[%s4423_s5 + $0x80] sm:$0xff]  }
 0x137   : > { %v3085_v59 = vadd.f32 %v2871_v10, %v2833_v4  ;;  %2125 = vmatpush1.bf16.msra.mxu1 %v3270_v0  ;;  %v3251_v0 = vld [vmem:[%s4423_s5 + $0x88] sm:$0xff]  }
 0x138   : > { %v2834_v12 = vpop.f32.mrb[4].mxu1 }
 0x139   : > { %v2835_v63 = vpop.f32.mrb[5].mxu1  ;;  %v2872_v19 = vpop.f32.mrb[4].mxu0 }
 0x13a   : > { %v2836_v8 = vadd.f32 %v2835_v63, %v2834_v12  ;;  %v2837_v17 = vpop.f32.mrb[6].mxu1  ;;  %v2873_v21 = vpop.f32.mrb[5].mxu0 }
 0x13b   : > { %v2838_v20 = vpop.f32.mrb[7].mxu1  ;;  %v2874_v28 = vadd.f32 %v2873_v21, %v2872_v19  ;;  %v2875_v29 = vpop.f32.mrb[6].mxu0 }
 0x13c   : > { %v2839_v27 = vadd.f32 %v2838_v20, %v2837_v17  ;;  %v2876_v30 = vpop.f32.mrb[7].mxu0 }
 0x13d   : > { %v3076_v32 = vadd.f32 %v2874_v28, %v2836_v8  ;;  %v2877_v33 = vadd.f32 %v2876_v30, %v2875_v29 }
 0x13f   : > { %v3082_v34 = vadd.f32 %v2877_v33, %v2839_v27 }
 0x151   : > { %v2904_v35 = vpop.f32.mrb[8].mxu0 }
 0x152   : > { %v2905_v36 = vpop.f32.mrb[9].mxu0 }
 0x153   : > { %v2906_v31 = vadd.f32 %v2905_v36, %v2904_v35  ;;  %v2907_v37 = vpop.f32.mrb[10].mxu0 }
 0x154   : > { %v2908_v38 = vpop.f32.mrb[11].mxu0 }
 0x155   : > { %v2909_v39 = vadd.f32 %v2908_v38, %v2907_v37  ;;  %v3080_v40 = vadd.f32 %v3079_v9, %v2906_v31 }
 0x157   : > { %v3086_v42 = vadd.f32 %v3085_v59, %v2909_v39 }
 0x159   : > { %v2910_v1 = vpop.f32.mrb[12].mxu0 }
 0x15a   : > { %v2911_v56 = vpop.f32.mrb[13].mxu0 }
 0x15b   : > { %v2912_v57 = vadd.f32 %v2911_v56, %v2910_v1  ;;  %v2913_v16 = vpop.f32.mrb[14].mxu0  ;;  %v3243_v1 = vld [vmem:[%s4423_s5 + $0x8] sm:$0xff]  }
 0x15c   : > { %v2914_v44 = vpop.f32.mrb[15].mxu0 }
 0x15d   : > { %v2915_v45 = vadd.f32 %v2914_v44, %v2913_v16  ;;  %v3077_v46 = vadd.f32 %v3076_v32, %v2912_v57 }
 0x15f   : > { %v3083_v52 = vadd.f32 %v3082_v34, %v2915_v45 }
 0x190   : > { %v3014_v2 = vpop.f32.mrb[8].mxu1 }
 0x191   : > { %v3078_v4 = vadd.f32 %v3077_v46, %v3014_v2  ;;  %v1556_v51 = vpop.f32.mrb[9].mxu1  ;;  %v3252_v2 = vld [vmem:[%s4423_s5 + $0x90] sm:$0xff]  }
 0x192   : > { %v3081_v58 = vadd.f32 %v3080_v40, %v1556_v51  ;;  %v3015_v5 = vpop.f32.mrb[10].mxu1  ;;  %v3257_v51 = vld [vmem:[%s4423_s5 + $0xb8] sm:$0xff]  }
 0x193   : > { %v1584_v6 = vmul.f32 %v3078_v4, %v2662_v61  ;;  %v3084_v9 = vadd.f32 %v3083_v52, %v3015_v5  ;;  %v1559_v10 = vpop.f32.mrb[11].mxu1  ;;  %v3256_v4 = vld [vmem:[%s4423_s5 + $0xb0] sm:$0xff]   ;;  %v3278_v5 = vld [vmem:[%s4426_s8 + $0x64] ss:$8 sps:$4 sm:$0xff]  }
 0x194   : > { %v1582_v59 = vmul.f32 %v3081_v58, %v2662_v61  ;;  %v3087_v12 = vadd.f32 %v3086_v42, %v1559_v10  ;;  %v3273_v58 = vld [vmem:[%s4426_s8 + $0x50] ss:$8 sps:$4 sm:$0xff]   ;;  %v3420_v10 = vmov 0  }
 0x195   : > { %v1595_v63 = vadd.f32 %v2663_v3, %v1584_v6  ;;  %v1585_v8 = vmul.f32 %v3084_v9, %v2662_v61  ;;  %v3281_v6 = vld [vmem:[%s4426_s8 + $0x74] ss:$8 sps:$4 sm:$0xff]   ;;  %v3279_v9 = vld [vmem:[%s4426_s8 + $0x70] ss:$8 sps:$4 sm:$0xff]   ;;  %2148 = vmatprep.mubr.bf16.mxu1 %v3420_v10 }
 0x196   : > { %v1593_v17 = vadd.f32 %v2663_v3, %v1582_v59  ;;  %v1583_v19 = vmul.f32 %v3087_v12, %v2662_v61  ;;  %v3253_v61 = vld [vmem:[%s4423_s5 + $0x98] sm:$0xff]   ;;  %v2732_v59 = vld [vmem:[%s4424_s6] ss:$0 sm:$0xff] }
 0x197   : > { %v1599_v20 = vmax.f32 %v1595_v63, 0.0  ;;  %v1596_v21 = vadd.f32 %v2663_v3, %v1585_v8  ;;  %v2733_v63 = vld [vmem:[%s4425_s7] ss:$0 sm:$0xff] }
 0x198   : > { %v1597_v27 = vmax.f32 %v1593_v17, 0.0  ;;  %v1594_v28 = vadd.f32 %v2663_v3, %v1583_v19  ;;  %v3275_v3 = vld [vmem:[%s4426_s8 + $0x54] ss:$8 sps:$4 sm:$0xff]  }
 0x199   : > { %v1600_v29 = vmax.f32 %v1596_v21, 0.0  ;;  %v1603_v30 = vrot.slane %v1599_v20, 7  ;;  %v1846_v35 = vrot.slane %v1599_v20, 1  ;;  %2126 = vmatprep.subr.bf16.mxu1 %v3275_v3 }
 0x19a   : > { %v1601_v32 = vrot.slane %v1597_v27, 7  ;;  %v1844_v33 = vrot.slane %v1597_v27, 1  ;;  %v1598_v34 = vmax.f32 %v1594_v28, 0.0  ;;  %2127 = vmatpush1.bf16.msra.mxu1 %v3273_v58 }
 0x19b   : > { %v1604_v36 = vrot.slane %v1600_v29, 7  ;;  %v1632_v31 = vpack.c.bf16 %v1600_v29, %v1599_v20  ;;  %v1847_v37 = vrot.slane %v1600_v29, 1  ;;  %2128 = vmatprep.subr.bf16.mxu1 %v3278_v5 }
 0x19c   : > { %v1602_v38 = vrot.slane %v1598_v34, 7  ;;  %v1845_v39 = vrot.slane %v1598_v34, 1  ;;  %v1631_v40 = vpack.c.bf16 %v1598_v34, %v1597_v27 }
 0x19d   : > { %v1608_v42 = vsel %vm571_vm0, %v1604_v36, %v1601_v32  ;;  %v1605_v56 = vsel %vm571_vm0, %v1603_v30, %v1604_v36  ;;  %v1848_v57 = vsel %vm1225_vm10, %v1846_v35, %v1847_v37  ;;  %v1851_v16 = vsel %vm1225_vm10, %v1847_v37, %v1844_v33 }
 0x19e   : > { %3032 = vmatprep.mubr.bf16.mxu0 %v1631_v40  ;;  %v1607_v44 = vsel %vm571_vm0, %v1601_v32, %v1602_v38  ;;  %v1606_v45 = vsel %vm571_vm0, %v1602_v38, %v1603_v30  ;;  %v1849_v46 = vsel %vm1225_vm10, %v1845_v39, %v1846_v35  ;;  %v1850_v48 = vsel %vm1225_vm10, %v1844_v33, %v1845_v39 }
 0x19f   : > { %3033 = vmatmul.mubr.bf16.vlgmr.msra.gmra.mrb[16].mxu0 %v1632_v31  ;;  %v2697_v50 = vpack.c.bf16 %v1607_v44, %v1608_v42  ;;  %v2700_v52 = vpack.c.bf16 %v1605_v56, %v1606_v45  ;;  %v2727_v53 = vpack.c.bf16 %v1849_v46, %v1850_v48  ;;  %v2730_v54 = vpack.c.bf16 %v1851_v16, %v1848_v57 }
 0x1a0   : > { %3037 = vmatpush3.bf16.msra.mxu0 %v4116_v22  ;;  %v3246_v22 = vld [vmem:[%s4423_s5 + $0x20] sm:$0xff]   ;;  %2129 = vmatpush1.bf16.msra.mxu1 %v3276_v47 }
 0x1a1   : > { %3052 = vmatprep.mubr.msk.bf16.mxu0 %vm3782_vm3, %v2697_v50  ;;  %3038 = vmatprep.subr.bf16.mxu0 %v3243_v1 }
 0x1a2   : > { %2130 = vmatprep.subr.bf16.mxu1 %v3281_v6 }
 0x1a4   : > { %3039 = vmatpush3.bf16.msra.mxu0 %v3243_v1  ;;  %2131 = vmatpush1.bf16.msra.mxu1 %v3279_v9 }
 0x1a5   : > { %3040 = vmatprep.subr.bf16.mxu0 %v3244_v55 }
 0x1a8   : > { %3041 = vmatpush3.bf16.msra.mxu0 %v3244_v55 }
 0x1a9   : > { %3042 = vmatprep.subr.bf16.mxu0 %v3245_v7 }
 0x1ac   : > { %3043 = vmatpush3.bf16.msra.mxu0 %v3245_v7 }
 0x1ad   : > { %3044 = vmatprep.subr.bf16.mxu0 %v3246_v22 }
 0x1b0   : > { %3045 = vmatpush3.bf16.msra.mxu0 %v3246_v22 }
 0x1b1   : > { %3046 = vmatprep.subr.bf16.mxu0 %v3247_v15 }
 0x1b4   : > { %3047 = vmatpush3.bf16.msra.mxu0 %v3247_v15 }
 0x1b5   : > { %3048 = vmatprep.subr.bf16.mxu0 %v3248_v11 }
 0x1b8   : > { %3049 = vmatpush3.bf16.msra.mxu0 %v3248_v11 }
 0x1b9   : > { %3050 = vmatprep.subr.bf16.mxu0 %v3249_v60 }
 0x1bc   : > { %3051 = vmatpush3.bf16.msra.mxu0 %v3249_v60 }
 0x1bd   : > { %3056 = vmatprep.subr.bf16.mxu0 %v3250_v62 }
 0x1bf   : > { %3053 = vmatmul.mubr.msk.bf16.vlgmr.msra.gmra.mrb[16].mxu0 %vm3841_vm6, %v2700_v52 }
 0x1c0   : > { %3057 = vmatpush3.bf16.msra.mxu0 %v3250_v62  ;;  %3072 = vmatprep.mubr.msk.bf16.mxu0 %vm3855_vm9, %v2727_v53 }
 0x1c1   : > { %3058 = vmatprep.subr.bf16.mxu0 %v3251_v0 }
 0x1c4   : > { %3059 = vmatpush3.bf16.msra.mxu0 %v3251_v0 }
 0x1c5   : > { %3060 = vmatprep.subr.bf16.mxu0 %v3252_v2 }
 0x1c8   : > { %3061 = vmatpush3.bf16.msra.mxu0 %v3252_v2 }
 0x1c9   : > { %3062 = vmatprep.subr.bf16.mxu0 %v3253_v61 }
 0x1cc   : > { %3063 = vmatpush3.bf16.msra.mxu0 %v3253_v61 }
 0x1cd   : > { %3064 = vmatprep.subr.bf16.mxu0 %v3254_v41 }
 0x1d0   : > { %3065 = vmatpush3.bf16.msra.mxu0 %v3254_v41 }
 0x1d1   : > { %3066 = vmatprep.subr.bf16.mxu0 %v3255_v49 }
 0x1d4   : > { %3067 = vmatpush3.bf16.msra.mxu0 %v3255_v49 }
 0x1d5   : > { %3068 = vmatprep.subr.bf16.mxu0 %v3256_v4 }
 0x1d8   : > { %3069 = vmatpush3.bf16.msra.mxu0 %v3256_v4 }
 0x1d9   : > { %3070 = vmatprep.subr.bf16.mxu0 %v3257_v51 }
 0x1dc   : > { %3071 = vmatpush3.bf16.msra.mxu0 %v3257_v51 }
 0x1df   : > { %3073 = vmatmul.mubr.msk.bf16.vlgmr.msra.gmra.mrb[16].mxu0 %vm4006_vm13, %v2730_v54 }
 0x2b2   : > { %v3074_v12 = vpop.f32.mrb[16].mxu0 }
 0x2b3   : > { %v1985_v8 = vmul.f32 %v3074_v12, %v2732_v59  ;;  %v1957_v17 = vpop.f32.mrb[17].mxu0 }
 0x2b4   : > { %v1983_v19 = vmul.f32 %v2732_v59, %v1957_v17  ;;  %v3075_v20 = vpop.f32.mrb[18].mxu0 }
 0x2b5   : > { %v1996_v21 = vadd.f32 %v2733_v63, %v1985_v8  ;;  %v1986_v27 = vmul.f32 %v3075_v20, %v2732_v59  ;;  %v1960_v28 = vpop.f32.mrb[19].mxu0 }
 0x2b6   : > { %v1994_v29 = vadd.f32 %v2733_v63, %v1983_v19  ;;  %v1984_v30 = vmul.f32 %v2732_v59, %v1960_v28 }
 0x2b7   : > { %v2000_v32 = vmax.f32 %v1996_v21, 0.0  ;;  %v1997_v33 = vadd.f32 %v2733_v63, %v1986_v27 }
 0x2b8   : > { %v1998_v34 = vmax.f32 %v1994_v29, 0.0  ;;  %v1995_v35 = vadd.f32 %v2733_v63, %v1984_v30 }
 0x2b9   : > { %2004 = vst [vmem:[%s425_s25 + $0x10] sm:$0xff] %v2000_v32  ;;  %v2001_v36 = vmax.f32 %v1997_v33, 0.0 }
 0x2ba   : > { %2002 = vst [vmem:[%s425_s25] sm:$0xff] %v1998_v34  ;;  %v1999_v31 = vmax.f32 %v1995_v35, 0.0 }
 0x2bb   : > { %2005 = vst [vmem:[%s425_s25 + $0x18] sm:$0xff] %v2001_v36  ;;  %v2007_v37 = vpack.c.bf16 %v2001_v36, %v2000_v32 }
 0x2bc   : > { %2003 = vst [vmem:[%s425_s25 + $0x8] sm:$0xff] %v1999_v31  ;;  %v2006_v38 = vpack.c.bf16 %v1999_v31, %v1998_v34  ;;  %s3323_s25 = scalar_lea.vmem %s3322_s24, 1024 }
 0x2bd   : > { %p3325_p0 = scmp.lt.s32.totalorder %s3323_s25, %s3317_s28 }
 0x2be   : > { %2149 = vmatmul.mubr.bf16.vlgmr.msra.gmra.mrb[12].mxu1 %v2006_v38 }
 0x2bf   : > { %2158 = vmatprep.mubr.bf16.mxu1 %v3420_v10  ;;  %p3326_p2 = por %p3325_p0, %p3324_p10 }
 0x2c1   : > { %p3327_p4 = pnand %p3326_p2, %p3320_p8 }
 0x2c6   : > { %2159 = vmatmul.mubr.bf16.gmra.mrb[16].mxu1 %v2007_v37 }
 0x2c7   : > { %3330 = shalt.err (!%p3327_p4)
}
 0x2c8   : > { %s3331_s16 = scalar_lea.hbm %s4256_s14, 512  ;;  %s3335_s26 = scalar_lea.hbm %s4428_s10, 1024 }
 0x2c9   : > { %p3332_p5 = scmp.ne.s32.totalorder %s4256_s14, %s3331_s16  ;;  %p3336_p1 = scmp.lt.u32.totalorder %s4256_s14, %s4428_s10 }
 0x2ca   : > { %p3337_p3 = scmp.lt.u32.totalorder %s3335_s26, %s3331_s16  ;;  %p3339_p11 = scmp.lt.u32.totalorder %s3331_s16, %s4256_s14 }
 0x2cb   : > { %p3333_p7 = pnand %p3332_p5, %p4448_p12 }
 0x2cc   : > { %p3338_p6 = por %p3337_p3, %p3336_p1 }
 0x2cd   : > { %p3334_p9 = pneg %p3333_p7 }
 0x2ce   : > { %p3340_p13 = por %p3339_p11, %p3338_p6 }
 0x2d0   : > { %p3341_p8 = pnand %p3340_p13, %p3334_p9 }
 0x2d2   : > { %3344 = shalt.err (!%p3341_p8)
}
 0x2d3   : > { %s3422_s28 = smov 128   ;;  %s3423_s25 = smov 8   ;;  %v2028_v39 = vsub.s32 0, %v3679_v26  ;;  %v2024_v40 = vld [vmem:[%s4427_s9] sm:$0x3]  ;;  %v2032_v42 = vsub.s32 1, %v3679_v26 }
 0x2d4   : > { %s4449_s15 = scalar_lea.sflag [#allocation4], %s3591_s22  ;;  %v2169_v57 = vld [vmem:[%s3597_s27] sm:$0xff]  ;;  %v2750_v44 = vld [vmem:[%s3597_s27 + $0x10] sm:$0xff]  ;;  %v3282_v3 = vld [vmem:[%s3597_s27 + $0x48] sm:$0xff]  ;;  %s2811_s12 = sshll.u32 %s3508_s21, 12 }
 0x2d5   : > { %3106 = dma.vmem_to_hbm [thread:$0]  (%p4448_p12), %s4250_s13, 512, %s4256_s14, %s4449_s15, %s3422_s28, %s3422_s28, %s3423_s25   ;;  %v4287_v1 = vrot.slane %v2024_v40, %v2028_v39  ;;  %v4289_v56 = vrot.slane %v2024_v40, %v2032_v42 }
 0x2d6   : > { %v2766_v45 = vld [vmem:[%s3597_s27 + $0x20] sm:$0xff]  ;;  %v2782_v46 = vld [vmem:[%s3597_s27 + $0x30] sm:$0xff]  ;;  %s4450_s13 = sshll.u32 %s3591_s22, 8  ;;  %v3283_v5 = vld [vmem:[%s3597_s27 + $0x58] sm:$0xff]  ;;  %s4364_s24 = scalar_lea.hbm %s4429_s11, %s2811_s12 }
 0x2d7   : > { %v2171_v22 = vld [vmem:[%s3597_s27 + $0x40] sm:$0xff]  ;;  %v2752_v2 = vld [vmem:[%s3597_s27 + $0x50] sm:$0xff]  ;;  %s4307_s14 = scalar_lea.vmem [#allocation6], %s4450_s13  ;;  %v3284_v32 = vld [vmem:[%s3597_s27 + $0x88] sm:$0xff]  ;;  %s2274_s28 = scalar_lea.sflag [#allocation7], %s3591_s22 }
 0x2d8   : > { %v2768_v61 = vld [vmem:[%s3597_s27 + $0x60] sm:$0xff]  ;;  %v2784_v41 = vld [vmem:[%s3597_s27 + $0x70] sm:$0xff]  ;;  %v3285_v34 = vld [vmem:[%s3597_s27 + $0x98] sm:$0xff]  ;;  %s2304_s26 = sshll.u32 %s4307_s14, 4  ;;  %s3424_s15 = smov [#allocation6]   ;;  %s4366_s26 = int_to_ptr.vmem [resolvable:$true] %s2304_s26 }
 0x2d9   : > { %v2173_v51 = vld [vmem:[%s3597_s27 + $0x80] sm:$0xff]  ;;  %v2754_v59 = vld [vmem:[%s3597_s27 + $0x90] sm:$0xff]  ;;  %v3286_v36 = vld [vmem:[%s3597_s27 + $0xa8] sm:$0xff]  ;;  %s3345_s25 = scalar_lea.vmem %s4366_s26, 4096  ;;  %s3349_s19 = sshll.u32 %s3424_s15, 4  ;;  %s3350_s19 = int_to_ptr.vmem [resolvable:$false] %s3349_s19 }
 0x2da   : > { %v2770_v12 = vld [vmem:[%s3597_s27 + $0xa0] sm:$0xff]  ;;  %v2786_v63 = vld [vmem:[%s3597_s27 + $0xb0] sm:$0xff]  ;;  %v2176_v40 = vld [vmem:[%s3597_s27 + $0xc8] sm:$0xff]  ;;  %p3346_p10 = scmp.ne.s32.totalorder %s4366_s26, %s3345_s25  ;;  %s3351_s16 = scalar_lea.vmem %s3350_s19, 8192 }
 0x2db   : > { %v2175_v28 = vld [vmem:[%s3597_s27 + $0xc0] sm:$0xff]  ;;  %v2756_v29 = vld [vmem:[%s3597_s27 + $0xd0] sm:$0xff]  ;;  %p3352_p4 = scmp.lt.s32.totalorder %s4366_s26, %s3350_s19  ;;  %p3353_p5 = scmp.lt.s32.totalorder %s3351_s16, %s3345_s25 }
 0x2dc   : > { %v2772_v38 = vld [vmem:[%s3597_s27 + $0xe0] sm:$0xff]  ;;  %v2788_v39 = vld [vmem:[%s3597_s27 + $0xf0] sm:$0xff]  ;;  %p3347_p0 = pnand %p3346_p10, %p4448_p12 }
 0x2dd   : > { %p3354_p7 = por %p3353_p5, %p3352_p4 }
 0x2de   : > { %p3348_p2 = pneg %p3347_p0 }
 0x2e0   : > { %p3355_p9 = pnand %p3354_p7, %p3348_p2 }
 0x391   : > { %v2150_v16 = vpop.f32.mrb[12].mxu1 }
 0x392   : > { %v2151_v48 = vadd.f32 %v2150_v16, %v4287_v1  ;;  %v2152_v50 = vpop.f32.mrb[13].mxu1  ;;  %v2757_v16 = vld [vmem:[%s3597_s27 + $0xd8] sm:$0xff] }
 0x393   : > { %v2153_v52 = vadd.f32 %v2152_v50, %v4289_v56  ;;  %v2154_v26 = vpop.f32.mrb[14].mxu1 }
 0x394   : > { %v2177_v53 = vadd.f32 %v2169_v57, %v2151_v48  ;;  %v2201_v54 = vadd.f32 %v2750_v44, %v2151_v48  ;;  %v2226_v55 = vadd.f32 %v2766_v45, %v2151_v48  ;;  %v2251_v7 = vadd.f32 %v2782_v46, %v2151_v48  ;;  %v2156_v15 = vpop.f32.mrb[15].mxu1  ;;  %v2773_v44 = vld [vmem:[%s3597_s27 + $0xe8] sm:$0xff]  ;;  %v2789_v45 = vld [vmem:[%s3597_s27 + $0xf8] sm:$0xff] }
 0x395   : > { %v2178_v11 = vadd.f32 %v2153_v52, %v3907_v13  ;;  %v2202_v60 = vadd.f32 %v3915_v14, %v2153_v52  ;;  %v2227_v62 = vadd.f32 %v3919_v18, %v2153_v52  ;;  %v2252_v0 = vadd.f32 %v3927_v24, %v2153_v52 }
 0x396   : > { %2185 = vst [vmem:[%s4307_s14] sm:$0xff] %v2177_v53  ;;  %2758 = vst [vmem:[%s4307_s14 + $0x10] sm:$0xff] %v2201_v54  ;;  %v2155_v13 = vadd.f32 %v2154_v26, %v4287_v1  ;;  %v2157_v14 = vadd.f32 %v2156_v15, %v4289_v56 }
 0x397   : > { %2774 = vst [vmem:[%s4307_s14 + $0x20] sm:$0xff] %v2226_v55  ;;  %2790 = vst [vmem:[%s4307_s14 + $0x30] sm:$0xff] %v2251_v7 }
 0x398   : > { %2186 = vst [vmem:[%s4307_s14 + $0x8] sm:$0xff] %v2178_v11  ;;  %2759 = vst [vmem:[%s4307_s14 + $0x18] sm:$0xff] %v2202_v60  ;;  %v2179_v18 = vadd.f32 %v2171_v22, %v2155_v13  ;;  %v2203_v24 = vadd.f32 %v2752_v2, %v2155_v13  ;;  %v2228_v49 = vadd.f32 %v2768_v61, %v2155_v13 }
 0x399   : > { %2775 = vst [vmem:[%s4307_s14 + $0x28] sm:$0xff] %v2227_v62  ;;  %2791 = vst [vmem:[%s4307_s14 + $0x38] sm:$0xff] %v2252_v0  ;;  %v2253_v4 = vadd.f32 %v2784_v41, %v2155_v13  ;;  %v2180_v58 = vadd.f32 %v3282_v3, %v2157_v14  ;;  %v2204_v47 = vadd.f32 %v3283_v5, %v2157_v14  ;;  %v2160_v10 = vpop.f32.mrb[16].mxu1 }
 0x39a   : > { %v2229_v6 = vadd.f32 %v3924_v23, %v2157_v14  ;;  %v2254_v9 = vadd.f32 %v3930_v25, %v2157_v14  ;;  %2187 = vst [vmem:[%s4307_s14 + $0x40] sm:$0xff] %v2179_v18  ;;  %2760 = vst [vmem:[%s4307_s14 + $0x50] sm:$0xff] %v2203_v24  ;;  %v2161_v8 = vadd.f32 %v2160_v10, %v4287_v1  ;;  %v2162_v17 = vpop.f32.mrb[17].mxu1 }
 0x39b   : > { %2776 = vst [vmem:[%s4307_s14 + $0x60] sm:$0xff] %v2228_v49  ;;  %2792 = vst [vmem:[%s4307_s14 + $0x70] sm:$0xff] %v2253_v4  ;;  %v2163_v23 = vadd.f32 %v2162_v17, %v4289_v56  ;;  %v2164_v25 = vpop.f32.mrb[18].mxu1 }
 0x39c   : > { %2188 = vst [vmem:[%s4307_s14 + $0x48] sm:$0xff] %v2180_v58  ;;  %2761 = vst [vmem:[%s4307_s14 + $0x58] sm:$0xff] %v2204_v47  ;;  %v2181_v19 = vadd.f32 %v2173_v51, %v2161_v8  ;;  %v2205_v20 = vadd.f32 %v2754_v59, %v2161_v8  ;;  %v2230_v21 = vadd.f32 %v2770_v12, %v2161_v8  ;;  %v2166_v30 = vpop.f32.mrb[19].mxu1 }
 0x39d   : > { %2777 = vst [vmem:[%s4307_s14 + $0x68] sm:$0xff] %v2229_v6  ;;  %2793 = vst [vmem:[%s4307_s14 + $0x78] sm:$0xff] %v2254_v9  ;;  %v2255_v27 = vadd.f32 %v2786_v63, %v2161_v8  ;;  %v2182_v33 = vadd.f32 %v3284_v32, %v2163_v23  ;;  %v2206_v35 = vadd.f32 %v3285_v34, %v2163_v23 }
 0x39e   : > { %v2231_v31 = vadd.f32 %v3286_v36, %v2163_v23  ;;  %v2256_v37 = vadd.f32 %v3967_v43, %v2163_v23  ;;  %2189 = vst [vmem:[%s4307_s14 + $0x80] sm:$0xff] %v2181_v19  ;;  %2762 = vst [vmem:[%s4307_s14 + $0x90] sm:$0xff] %v2205_v20  ;;  %v2165_v42 = vadd.f32 %v2164_v25, %v4287_v1 }
 0x39f   : > { %2778 = vst [vmem:[%s4307_s14 + $0xa0] sm:$0xff] %v2230_v21  ;;  %2794 = vst [vmem:[%s4307_s14 + $0xb0] sm:$0xff] %v2255_v27  ;;  %v2167_v57 = vadd.f32 %v2166_v30, %v4289_v56 }
 0x3a0   : > { %2190 = vst [vmem:[%s4307_s14 + $0x88] sm:$0xff] %v2182_v33  ;;  %2763 = vst [vmem:[%s4307_s14 + $0x98] sm:$0xff] %v2206_v35  ;;  %v2183_v43 = vadd.f32 %v2175_v28, %v2165_v42  ;;  %v2207_v46 = vadd.f32 %v2756_v29, %v2165_v42  ;;  %v2232_v1 = vadd.f32 %v2772_v38, %v2165_v42 }
 0x3a1   : > { %2779 = vst [vmem:[%s4307_s14 + $0xa8] sm:$0xff] %v2231_v31  ;;  %2795 = vst [vmem:[%s4307_s14 + $0xb8] sm:$0xff] %v2256_v37  ;;  %v2257_v56 = vadd.f32 %v2788_v39, %v2165_v42  ;;  %v2184_v48 = vadd.f32 %v2176_v40, %v2167_v57  ;;  %v2208_v50 = vadd.f32 %v2757_v16, %v2167_v57 }
 0x3a2   : > { %v2233_v52 = vadd.f32 %v2773_v44, %v2167_v57  ;;  %v2258_v26 = vadd.f32 %v2789_v45, %v2167_v57  ;;  %2191 = vst [vmem:[%s4307_s14 + $0xc0] sm:$0xff] %v2183_v43  ;;  %2764 = vst [vmem:[%s4307_s14 + $0xd0] sm:$0xff] %v2207_v46 }
 0x3a3   : > { %2780 = vst [vmem:[%s4307_s14 + $0xe0] sm:$0xff] %v2232_v1  ;;  %2796 = vst [vmem:[%s4307_s14 + $0xf0] sm:$0xff] %v2257_v56 }
 0x3a4   : > { %2192 = vst [vmem:[%s4307_s14 + $0xc8] sm:$0xff] %v2184_v48  ;;  %2765 = vst [vmem:[%s4307_s14 + $0xd8] sm:$0xff] %v2208_v50 }
 0x3a5   : > { %2781 = vst [vmem:[%s4307_s14 + $0xe8] sm:$0xff] %v2233_v52  ;;  %2797 = vst [vmem:[%s4307_s14 + $0xf8] sm:$0xff] %v2258_v26 }
 0x3a6   : > { %3358 = shalt.err (!%p3355_p9)
}
 0x3a7   : > { %s3359_s13 = scalar_lea.hbm %s4364_s24, 4096  ;;  %s3363_s21 = scalar_lea.hbm %s4429_s11, 8192 }
 0x3a8   : > { %p3360_p1 = scmp.ne.s32.totalorder %s4364_s24, %s3359_s13  ;;  %p3364_p11 = scmp.lt.u32.totalorder %s4364_s24, %s4429_s11 }
 0x3a9   : > { %p3365_p13 = scmp.lt.u32.totalorder %s3363_s21, %s3359_s13  ;;  %p3367_p10 = scmp.lt.u32.totalorder %s3359_s13, %s4364_s24 }
 0x3aa   : > { %p3361_p3 = pnand %p3360_p1, %p4448_p12 }
 0x3ab   : > { %p3366_p8 = por %p3365_p13, %p3364_p11 }
 0x3ac   : > { %p3362_p6 = pneg %p3361_p3 }
 0x3ad   : > { %p3368_p0 = por %p3367_p10, %p3366_p8 }
 0x3af   : > { %p3369_p2 = pnand %p3368_p0, %p3362_p6 }
 0x3b1   : > { %3372 = shalt.err (!%p3369_p2)
}
 0x3b2   : > { %s3425_s25 = smov 256   ;;  %s3426_s19 = smov 16  }
 0x3b3   : > { %3107 = dma.vmem_to_hbm [thread:$0]  (%p4448_p12), %s4366_s26, 4096, %s4364_s24, %s2274_s28, %s3425_s25, %s3425_s25, %s3426_s19  }
 0x3b4 PF: > { %s2319_s16 = sand.u32 1, %s3403_s17   ;;  %p4451_p4 = scmp.ne.s32.totalorder %s4438_s30, 0 }
 0x3b5   : > { %p4452_p5 = scmp.ge.s32.totalorder %s3415_s20, 2  ;;  %s2320_s13 = scalar_lea.sflag [#allocation4], %s2319_s16 }
 0x3b7   : > { %p3115_p7 = pnand %p4452_p5, %p4451_p4 }
 0x3b9   : > { %3394 = dma.done.wait (!%p3115_p7), %s2320_s13, 512  }
 0x3ba   : > { %3396 = vsyncadd (!%p3115_p7), %s2320_s13, 4294966784  ;;  %s2329_s14 = scalar_lea.sflag [#allocation7], %s2319_s16 }
 0x3bb   : > { %3398 = dma.done.wait (!%p3115_p7), %s2329_s14, 4096  }
 0x3bc   : > { %3400 = vsyncadd (!%p3115_p7), %s2329_s14, 4294963200  ;;  %s4453_s12 = sld [smem:[#allocation11_spill]]  ;;  %s4454_s19 = sld [smem:[#allocation12_spill]] }
 0x3bd   : > { %p28_p12 = scmp.ge.s32.totalorder %s3512_s23, 4   ;;  %s4455_s17 = smov %s3407_s18 }
 0x3be   : > { %s4457_s20 = smov %s3512_s23 }
 0x3bf   :  { %30 = sbr.rel (!%p28_p12) target bundleno = 7 (0x7), region = 135 }
 0x3c2   : > { %s4456_s18 = smov %s4453_s12 }
 0x3c6   :  { %2334 = vsyncpa [#allocation3], 1 }
 0x3c7   :  { %2336 = vsyncpa [#allocation3 + $0x1], 1 }
 0x3c8   :  { %2337 = vsyncpa [#allocation4], 1 }
 0x3c9   :  { %2339 = vsyncpa [#allocation4 + $0x1], 1 }
 0x3ca   :  { %2340 = vsyncpa [#allocation7], 1 }
 0x3cb   :  { %2342 = vsyncpa [#allocation7 + $0x1], 1 }

</bundles_post_ra>
